<compile_context>
chip_gen: v6e
topology: v6e:2x2x1
jax: 0.10.0
libtpu: 0.0.40
codegen_flags: <defaults>
</compile_context>

<pallas_src>
import numpy as np
import jax
import jax.numpy as jnp
from jax import lax
from jax.experimental import pallas as pl
from jax.experimental.pallas import tpu as pltpu


def _round_up(x, m):
    return (x + m - 1) // m * m


def _make_resblock_kernel(Cin_p, Cout_p, Lc, Wp, F, has_projection):
    halo = Wp + 1                                              # max |tap shift| (flat)
    taps = [dy * Wp + dx for dy in range(3) for dx in range(3)]  # t = dy*3+dx

    def kernel(x_ref, mask_ref, w1_ref, t1_ref, w2_ref, t2_ref, o_ref,
               col1_ref, hext_ref, col2_ref):
        def dot(a, b):  # MXU matmul, exact f32 accumulation
            return jnp.dot(a, b, precision=lax.Precision.HIGHEST,
                           preferred_element_type=jnp.float32)

        # ---- conv1: in-kernel im2col (9 shifted channel slabs), one deep matmul ----
        for t, a in enumerate(taps):
            s = F - halo + a
            col1_ref[t * Cin_p:(t + 1) * Cin_p, :] = x_ref[0, :, s:s + Lc]
        # folded BN1 scale lives in w1; add shift, ReLU, then zero the 1-pixel ring /
        # lane overhang — this *is* conv2's zero padding.
        h = jnp.maximum(dot(w1_ref[...], col1_ref[...]) + t1_ref[...], 0.0)
        h = h * mask_ref[...]

        # stage conv1 activation with a lane-aligned halo for conv2's shifted taps
        hext_ref[...] = jnp.zeros_like(hext_ref)
        hext_ref[:, F:F + Lc] = h

        # ---- conv2 im2col (+ shortcut input appended as extra contraction rows) ----
        for t, a in enumerate(taps):
            s = F - halo + a
            col2_ref[t * Cout_p:(t + 1) * Cout_p, :] = hext_ref[:, s:s + Lc]

        xc = x_ref[0, :, F:F + Lc]                             # center tap of input
        if has_projection:
            col2_ref[9 * Cout_p:, :] = xc                      # 1x1 conv folded in
            o_ref[0] = jnp.maximum(dot(w2_ref[...], col2_ref[...]) + t2_ref[...], 0.0)
        else:
            o_ref[0] = jnp.maximum(dot(w2_ref[...], col2_ref[...]) + t2_ref[...] + xc,
                                   0.0)

    return kernel


def _bn_fold(gamma, beta, mean, var, conv_bias, eps):
    scale = gamma / jnp.sqrt(var + eps)
    shift = beta + scale * (conv_bias - mean)
    return scale, shift


def _pack_w3x3_scaled(w_oihw, scale, co_p, ci_p):
    co, ci = w_oihw.shape[0], w_oihw.shape[1]
    w = w_oihw * scale.reshape(co, 1, 1, 1)                    # fold BN scale
    w = jnp.transpose(w, (2, 3, 0, 1)).reshape(9, co, ci)      # [tap, O, I]
    w = jnp.pad(w, ((0, 0), (0, co_p - co), (0, ci_p - ci)))   # [9, O_p, I_p]
    w = jnp.transpose(w, (1, 0, 2)).reshape(co_p, 9 * ci_p)    # [O_p, 9*I_p]
    return w


def residual_block_pallas(x_nchw, p, eps=1e-5):
    x = x_nchw.astype(jnp.float32)                 # stays NCHW (channel-major)
    N, Cin, H, W = x.shape
    Cout = p["conv1_w"].shape[0]
    Hp, Wp = H + 2, W + 2
    L = Hp * Wp                                    # flattened padded-spatial size
    Lc = _round_up(L, 128)                         # lane-dense compute width
    halo = Wp + 1
    F = _round_up(halo, 128)                       # lane-aligned front halo
    E = _round_up(F + halo + Lc, 128)              # extended (haloed) lane width
    Cin_p = _round_up(Cin, 8)
    Cout_p = _round_up(Cout, 8)
    has_projection = "convs_w" in p
    if not has_projection:
        assert Cin == Cout, "identity shortcut requires in_channels == out_channels"

    # input: spatial zero-pad, flatten spatial to lanes, add aligned flat halo
    xp = jnp.pad(x, ((0, 0), (0, Cin_p - Cin), (1, 1), (1, 1))).reshape(N, Cin_p, L)
    xp = jnp.pad(xp, ((0, 0), (0, 0), (F, E - F - L)))          # (N, Cin_p, E)

    # interior mask over the flattened padded grid (1 inside the image, 0 elsewhere)
    mask = jnp.pad(jnp.ones((H, W), jnp.float32), ((1, 1), (1, 1))).reshape(1, L)
    mask = jnp.pad(mask, ((0, 0), (0, Lc - L)))                 # (1, Lc)

    # fold BN into weights/shifts; fold the shortcut 1x1 conv into conv2's matmul
    s1, t1 = _bn_fold(p["bn1_g"], p["bn1_b"], p["bn1_m"], p["bn1_v"], p["conv1_b"], eps)
    s2, t2 = _bn_fold(p["bn2_g"], p["bn2_b"], p["bn2_m"], p["bn2_v"], p["conv2_b"], eps)
    w1 = _pack_w3x3_scaled(p["conv1_w"], s1, Cout_p, Cin_p)     # (Cout_p, 9*Cin_p)
    w2 = _pack_w3x3_scaled(p["conv2_w"], s2, Cout_p, Cout_p)    # (Cout_p, 9*Cout_p)
    tout = t2
    if has_projection:
        ss, ts = _bn_fold(p["bns_g"], p["bns_b"], p["bns_m"], p["bns_v"],
                          p["convs_b"], eps)
        ws = p["convs_w"][:, :, 0, 0] * ss[:, None]
        ws = jnp.pad(ws, ((0, Cout_p - Cout), (0, Cin_p - Cin)))
        w2 = jnp.concatenate([w2, ws], axis=1)                  # (Cout_p, 9*Cout_p+Cin_p)
        tout = t2 + ts
    t1p = jnp.pad(t1, (0, Cout_p - Cout)).reshape(Cout_p, 1)
    toutp = jnp.pad(tout, (0, Cout_p - Cout)).reshape(Cout_p, 1)
    K2 = w2.shape[1]

    def full_spec(shape):
        nd = len(shape)
        return pl.BlockSpec(shape, lambda n, _nd=nd: (0,) * _nd)

    kernel = _make_resblock_kernel(Cin_p, Cout_p, Lc, Wp, F, has_projection)

    grid_spec = pltpu.PrefetchScalarGridSpec(
        num_scalar_prefetch=0,
        grid=(N,),
        in_specs=[
            pl.BlockSpec((1, Cin_p, E), lambda n: (n, 0, 0)),
            full_spec((1, Lc)),
            full_spec(w1.shape),
            full_spec((Cout_p, 1)),
            full_spec(w2.shape),
            full_spec((Cout_p, 1)),
        ],
        out_specs=pl.BlockSpec((1, Cout_p, Lc), lambda n: (n, 0, 0)),
        scratch_shapes=[
            pltpu.VMEM((9 * Cin_p, Lc), jnp.float32),   # im2col for conv1
            pltpu.VMEM((Cout_p, E), jnp.float32),       # haloed conv1 activation
            pltpu.VMEM((K2, Lc), jnp.float32),          # im2col for conv2 (+shortcut)
        ],
    )
    out = pl.pallas_call(
        kernel,
        out_shape=jax.ShapeDtypeStruct((N, Cout_p, Lc), jnp.float32),
        grid_spec=grid_spec,
        compiler_params=pltpu.CompilerParams(dimension_semantics=("parallel",)),
    )(xp, mask, w1, t1p, w2, toutp)

    # drop lane overhang / channel padding / halo ring -> NCHW
    out = out[:, :, :L].reshape(N, Cout_p, Hp, Wp)[:, :Cout, 1:1 + H, 1:1 + W]
    return out


def residual_block_ref(x_nchw, p, eps=1e-5):
    # Pure-JAX reference mirroring the PyTorch forward (eval-mode BN).
    x = jnp.transpose(x_nchw, (0, 2, 3, 1)).astype(jnp.float32)
    dn = ("NHWC", "HWIO", "NHWC")

    def conv(z, w_oihw, b, pad):
        w = jnp.transpose(w_oihw, (2, 3, 1, 0))
        y = lax.conv_general_dilated(z, w, (1, 1), ((pad, pad), (pad, pad)),
                                     dimension_numbers=dn,
                                     precision=lax.Precision.HIGHEST)
        return y + b

    def bn(y, g, b, m, v):
        return (y - m) / jnp.sqrt(v + eps) * g + b

    h = jax.nn.relu(bn(conv(x, p["conv1_w"], p["conv1_b"], 1),
                       p["bn1_g"], p["bn1_b"], p["bn1_m"], p["bn1_v"]))
    out = bn(conv(h, p["conv2_w"], p["conv2_b"], 1),
             p["bn2_g"], p["bn2_b"], p["bn2_m"], p["bn2_v"])
    if "convs_w" in p:
        sc = bn(conv(x, p["convs_w"], p["convs_b"], 0),
                p["bns_g"], p["bns_b"], p["bns_m"], p["bns_v"])
    else:
        sc = x
    return jnp.transpose(jax.nn.relu(out + sc), (0, 3, 1, 2))


if __name__ == "__main__":
    def make_params(key, cin, cout, projection):
        ks = jax.random.split(key, 20)
        f32 = jnp.float32
        prm = {
            "conv1_w": jax.random.normal(ks[0], (cout, cin, 3, 3), f32) * 0.2,
            "conv1_b": jax.random.normal(ks[1], (cout,), f32) * 0.1,
            "bn1_g": jax.random.uniform(ks[2], (cout,), f32, 0.5, 1.5),
            "bn1_b": jax.random.normal(ks[3], (cout,), f32) * 0.1,
            "bn1_m": jax.random.normal(ks[4], (cout,), f32) * 0.1,
            "bn1_v": jax.random.uniform(ks[5], (cout,), f32, 0.5, 1.5),
            "conv2_w": jax.random.normal(ks[6], (cout, cout, 3, 3), f32) * 0.2,
            "conv2_b": jax.random.normal(ks[7], (cout,), f32) * 0.1,
            "bn2_g": jax.random.uniform(ks[8], (cout,), f32, 0.5, 1.5),
            "bn2_b": jax.random.normal(ks[9], (cout,), f32) * 0.1,
            "bn2_m": jax.random.normal(ks[10], (cout,), f32) * 0.1,
            "bn2_v": jax.random.uniform(ks[11], (cout,), f32, 0.5, 1.5),
        }
        if projection:
            prm.update({
                "convs_w": jax.random.normal(ks[12], (cout, cin, 1, 1), f32) * 0.2,
                "convs_b": jax.random.normal(ks[13], (cout,), f32) * 0.1,
                "bns_g": jax.random.uniform(ks[14], (cout,), f32, 0.5, 1.5),
                "bns_b": jax.random.normal(ks[15], (cout,), f32) * 0.1,
                "bns_m": jax.random.normal(ks[16], (cout,), f32) * 0.1,
                "bns_v": jax.random.uniform(ks[17], (cout,), f32, 0.5, 1.5),
            })
        return prm

    key = jax.random.PRNGKey(0)
    k1, k2, kx1, kx2 = jax.random.split(key, 4)

    # case 1: projection shortcut (in_channels != out_channels)
    p1 = make_params(k1, 4, 8, True)
    x1 = jax.random.normal(kx1, (2, 4, 16, 16), jnp.float32)
    out1 = jax.block_until_ready(residual_block_pallas(x1, p1))
    ref1 = jax.block_until_ready(residual_block_ref(x1, p1))
    np.testing.assert_allclose(np.asarray(out1), np.asarray(ref1), rtol=1e-4, atol=1e-4)

    # case 2: identity shortcut (in_channels == out_channels, stride 1)
    p2 = make_params(k2, 8, 8, False)
    x2 = jax.random.normal(kx2, (2, 8, 16, 16), jnp.float32)
    out2 = jax.block_until_ready(residual_block_pallas(x2, p2))
    ref2 = jax.block_until_ready(residual_block_ref(x2, p2))
    np.testing.assert_allclose(np.asarray(out2), np.asarray(ref2), rtol=1e-4, atol=1e-4)

    print("KERNEL_OK")
</pallas_src>

<mosaic_0001>
module attributes {stable_mosaic.version = 11 : i64} {
  func.func @kernel(%arg0: i32, %arg1: memref<1x8x640xf32, #tpu.memory_space<vmem>>, %arg2: memref<1x384xf32, #tpu.memory_space<vmem>>, %arg3: memref<8x72xf32, #tpu.memory_space<vmem>>, %arg4: memref<8x1xf32, #tpu.memory_space<vmem>>, %arg5: memref<8x80xf32, #tpu.memory_space<vmem>>, %arg6: memref<8x1xf32, #tpu.memory_space<vmem>>, %arg7: memref<1x8x384xf32, #tpu.memory_space<vmem>>, %arg8: memref<72x384xf32, #tpu.memory_space<vmem>>, %arg9: memref<8x640xf32, #tpu.memory_space<vmem>>, %arg10: memref<80x384xf32, #tpu.memory_space<vmem>>) attributes {dimension_semantics = [#tpu.dimension_semantics<parallel>], iteration_bounds = array<i64: 2>, scalar_prefetch = 0 : i64, scratch_operands = 3 : i64, tpu.core_type = #tpu.core_type<tc>, window_params = [{transform_indices = @transform_0, window_bounds = array<i64: 1, 8, 640>}, {pipeline_mode = #tpu.pipeline_mode<synchronous>, transform_indices = @transform_1, window_bounds = array<i64: 1, 384>}, {pipeline_mode = #tpu.pipeline_mode<synchronous>, transform_indices = @transform_2, window_bounds = array<i64: 8, 72>}, {pipeline_mode = #tpu.pipeline_mode<synchronous>, transform_indices = @transform_3, window_bounds = array<i64: 8, 1>}, {pipeline_mode = #tpu.pipeline_mode<synchronous>, transform_indices = @transform_4, window_bounds = array<i64: 8, 80>}, {pipeline_mode = #tpu.pipeline_mode<synchronous>, transform_indices = @transform_5, window_bounds = array<i64: 8, 1>}, {transform_indices = @transform_6, window_bounds = array<i64: 1, 8, 384>}]} {
    %c0 = arith.constant 0 : index
    %c0_0 = arith.constant 0 : index
    %c109 = arith.constant 109 : index
    %0 = vector.load %arg1[%c0, %c0_0, %c109] : memref<1x8x640xf32, #tpu.memory_space<vmem>>, vector<1x8x384xf32>
    %1 = vector.shape_cast %0 : vector<1x8x384xf32> to vector<8x384xf32>
    %c0_1 = arith.constant 0 : index
    %c0_2 = arith.constant 0 : index
    %2 = vector.load %arg8[%c0_1, %c0_2] : memref<72x384xf32, #tpu.memory_space<vmem>>, vector<8x384xf32>
    tpu.vector_store %arg8[%c0_1, %c0_2], %1 {strides = array<i32>} : memref<72x384xf32, #tpu.memory_space<vmem>>, vector<8x384xf32>,
    %c0_3 = arith.constant 0 : index
    %c0_4 = arith.constant 0 : index
    %c110 = arith.constant 110 : index
    %3 = vector.load %arg1[%c0_3, %c0_4, %c110] : memref<1x8x640xf32, #tpu.memory_space<vmem>>, vector<1x8x384xf32>
    %4 = vector.shape_cast %3 : vector<1x8x384xf32> to vector<8x384xf32>
    %c8 = arith.constant 8 : index
    %c0_5 = arith.constant 0 : index
    %5 = vector.load %arg8[%c8, %c0_5] : memref<72x384xf32, #tpu.memory_space<vmem>>, vector<8x384xf32>
    tpu.vector_store %arg8[%c8, %c0_5], %4 {strides = array<i32>} : memref<72x384xf32, #tpu.memory_space<vmem>>, vector<8x384xf32>,
    %c0_6 = arith.constant 0 : index
    %c0_7 = arith.constant 0 : index
    %c111 = arith.constant 111 : index
    %6 = vector.load %arg1[%c0_6, %c0_7, %c111] : memref<1x8x640xf32, #tpu.memory_space<vmem>>, vector<1x8x384xf32>
    %7 = vector.shape_cast %6 : vector<1x8x384xf32> to vector<8x384xf32>
    %c16 = arith.constant 16 : index
    %c0_8 = arith.constant 0 : index
    %8 = vector.load %arg8[%c16, %c0_8] : memref<72x384xf32, #tpu.memory_space<vmem>>, vector<8x384xf32>
    tpu.vector_store %arg8[%c16, %c0_8], %7 {strides = array<i32>} : memref<72x384xf32, #tpu.memory_space<vmem>>, vector<8x384xf32>,
    %c0_9 = arith.constant 0 : index
    %c0_10 = arith.constant 0 : index
    %c127 = arith.constant 127 : index
    %9 = vector.load %arg1[%c0_9, %c0_10, %c127] : memref<1x8x640xf32, #tpu.memory_space<vmem>>, vector<1x8x384xf32>
    %10 = vector.shape_cast %9 : vector<1x8x384xf32> to vector<8x384xf32>
    %c24 = arith.constant 24 : index
    %c0_11 = arith.constant 0 : index
    %11 = vector.load %arg8[%c24, %c0_11] : memref<72x384xf32, #tpu.memory_space<vmem>>, vector<8x384xf32>
    tpu.vector_store %arg8[%c24, %c0_11], %10 {strides = array<i32>} : memref<72x384xf32, #tpu.memory_space<vmem>>, vector<8x384xf32>,
    %c0_12 = arith.constant 0 : index
    %c0_13 = arith.constant 0 : index
    %c128 = arith.constant 128 : index
    %12 = vector.load %arg1[%c0_12, %c0_13, %c128] : memref<1x8x640xf32, #tpu.memory_space<vmem>>, vector<1x8x384xf32>
    %13 = vector.shape_cast %12 : vector<1x8x384xf32> to vector<8x384xf32>
    %c32 = arith.constant 32 : index
    %c0_14 = arith.constant 0 : index
    %14 = vector.load %arg8[%c32, %c0_14] : memref<72x384xf32, #tpu.memory_space<vmem>>, vector<8x384xf32>
    tpu.vector_store %arg8[%c32, %c0_14], %13 {strides = array<i32>} : memref<72x384xf32, #tpu.memory_space<vmem>>, vector<8x384xf32>,
    %c0_15 = arith.constant 0 : index
    %c0_16 = arith.constant 0 : index
    %c129 = arith.constant 129 : index
    %15 = vector.load %arg1[%c0_15, %c0_16, %c129] : memref<1x8x640xf32, #tpu.memory_space<vmem>>, vector<1x8x384xf32>
    %16 = vector.shape_cast %15 : vector<1x8x384xf32> to vector<8x384xf32>
    %c40 = arith.constant 40 : index
    %c0_17 = arith.constant 0 : index
    %17 = vector.load %arg8[%c40, %c0_17] : memref<72x384xf32, #tpu.memory_space<vmem>>, vector<8x384xf32>
    tpu.vector_store %arg8[%c40, %c0_17], %16 {strides = array<i32>} : memref<72x384xf32, #tpu.memory_space<vmem>>, vector<8x384xf32>,
    %c0_18 = arith.constant 0 : index
    %c0_19 = arith.constant 0 : index
    %c145 = arith.constant 145 : index
    %18 = vector.load %arg1[%c0_18, %c0_19, %c145] : memref<1x8x640xf32, #tpu.memory_space<vmem>>, vector<1x8x384xf32>
    %19 = vector.shape_cast %18 : vector<1x8x384xf32> to vector<8x384xf32>
    %c48 = arith.constant 48 : index
    %c0_20 = arith.constant 0 : index
    %20 = vector.load %arg8[%c48, %c0_20] : memref<72x384xf32, #tpu.memory_space<vmem>>, vector<8x384xf32>
    tpu.vector_store %arg8[%c48, %c0_20], %19 {strides = array<i32>} : memref<72x384xf32, #tpu.memory_space<vmem>>, vector<8x384xf32>,
    %c0_21 = arith.constant 0 : index
    %c0_22 = arith.constant 0 : index
    %c146 = arith.constant 146 : index
    %21 = vector.load %arg1[%c0_21, %c0_22, %c146] : memref<1x8x640xf32, #tpu.memory_space<vmem>>, vector<1x8x384xf32>
    %22 = vector.shape_cast %21 : vector<1x8x384xf32> to vector<8x384xf32>
    %c56 = arith.constant 56 : index
    %c0_23 = arith.constant 0 : index
    %23 = vector.load %arg8[%c56, %c0_23] : memref<72x384xf32, #tpu.memory_space<vmem>>, vector<8x384xf32>
    tpu.vector_store %arg8[%c56, %c0_23], %22 {strides = array<i32>} : memref<72x384xf32, #tpu.memory_space<vmem>>, vector<8x384xf32>,
    %c0_24 = arith.constant 0 : index
    %c0_25 = arith.constant 0 : index
    %c147 = arith.constant 147 : index
    %24 = vector.load %arg1[%c0_24, %c0_25, %c147] : memref<1x8x640xf32, #tpu.memory_space<vmem>>, vector<1x8x384xf32>
    %25 = vector.shape_cast %24 : vector<1x8x384xf32> to vector<8x384xf32>
    %c64 = arith.constant 64 : index
    %c0_26 = arith.constant 0 : index
    %26 = vector.load %arg8[%c64, %c0_26] : memref<72x384xf32, #tpu.memory_space<vmem>>, vector<8x384xf32>
    tpu.vector_store %arg8[%c64, %c0_26], %25 {strides = array<i32>} : memref<72x384xf32, #tpu.memory_space<vmem>>, vector<8x384xf32>,
    %c0_27 = arith.constant 0 : index
    %c0_28 = arith.constant 0 : index
    %27 = vector.load %arg3[%c0_27, %c0_28] : memref<8x72xf32, #tpu.memory_space<vmem>>, vector<8x72xf32>
    %c0_29 = arith.constant 0 : index
    %c0_30 = arith.constant 0 : index
    %28 = vector.load %arg8[%c0_29, %c0_30] : memref<72x384xf32, #tpu.memory_space<vmem>>, vector<72x384xf32>
    %cst = arith.constant dense<0.000000e+00> : vector<8x384xf32>
    %29 = tpu.matmul %27, %28, %cst {dimension_numbers = #tpu.dot_dimension_numbers<[1], [0], [0], [1], [0, 0, 1, 1], [], []>, precision = #tpu.contract_precision<fp32>} : vector<8x72xf32>, vector<72x384xf32>, vector<8x384xf32> -> vector<8x384xf32>
    %c0_31 = arith.constant 0 : index
    %c0_32 = arith.constant 0 : index
    %30 = vector.load %arg4[%c0_31, %c0_32] : memref<8x1xf32, #tpu.memory_space<vmem>>, vector<8x1xf32>
    %31 = vector.broadcast %30 : vector<8x1xf32> to vector<8x384xf32>
    %32 = arith.addf %29, %31 : vector<8x384xf32>
    %cst_33 = arith.constant 0.000000e+00 : f32
    %33 = vector.broadcast %cst_33 : f32 to vector<8x384xf32>
    %34 = arith.maximumf %32, %33 : vector<8x384xf32>
    %c0_34 = arith.constant 0 : index
    %c0_35 = arith.constant 0 : index
    %35 = vector.load %arg2[%c0_34, %c0_35] : memref<1x384xf32, #tpu.memory_space<vmem>>, vector<1x384xf32>
    %36 = vector.broadcast %35 : vector<1x384xf32> to vector<8x384xf32>
    %37 = arith.mulf %34, %36 : vector<8x384xf32>
    %cst_36 = arith.constant 0.000000e+00 : f32
    %38 = vector.broadcast %cst_36 : f32 to vector<8x640xf32>
    %c0_37 = arith.constant 0 : index
    %c0_38 = arith.constant 0 : index
    %39 = vector.load %arg9[%c0_37, %c0_38] : memref<8x640xf32, #tpu.memory_space<vmem>>, vector<8x640xf32>
    tpu.vector_store %arg9[%c0_37, %c0_38], %38 {strides = array<i32>} : memref<8x640xf32, #tpu.memory_space<vmem>>, vector<8x640xf32>,
    %c0_39 = arith.constant 0 : index
    %c128_40 = arith.constant 128 : index
    %40 = vector.load %arg9[%c0_39, %c128_40] : memref<8x640xf32, #tpu.memory_space<vmem>>, vector<8x384xf32>
    tpu.vector_store %arg9[%c0_39, %c128_40], %37 {strides = array<i32>} : memref<8x640xf32, #tpu.memory_space<vmem>>, vector<8x384xf32>,
    %c0_41 = arith.constant 0 : index
    %c109_42 = arith.constant 109 : index
    %41 = vector.load %arg9[%c0_41, %c109_42] : memref<8x640xf32, #tpu.memory_space<vmem>>, vector<8x384xf32>
    %c0_43 = arith.constant 0 : index
    %c0_44 = arith.constant 0 : index
    %42 = vector.load %arg10[%c0_43, %c0_44] : memref<80x384xf32, #tpu.memory_space<vmem>>, vector<8x384xf32>
    tpu.vector_store %arg10[%c0_43, %c0_44], %41 {strides = array<i32>} : memref<80x384xf32, #tpu.memory_space<vmem>>, vector<8x384xf32>,
    %c0_45 = arith.constant 0 : index
    %c110_46 = arith.constant 110 : index
    %43 = vector.load %arg9[%c0_45, %c110_46] : memref<8x640xf32, #tpu.memory_space<vmem>>, vector<8x384xf32>
    %c8_47 = arith.constant 8 : index
    %c0_48 = arith.constant 0 : index
    %44 = vector.load %arg10[%c8_47, %c0_48] : memref<80x384xf32, #tpu.memory_space<vmem>>, vector<8x384xf32>
    tpu.vector_store %arg10[%c8_47, %c0_48], %43 {strides = array<i32>} : memref<80x384xf32, #tpu.memory_space<vmem>>, vector<8x384xf32>,
    %c0_49 = arith.constant 0 : index
    %c111_50 = arith.constant 111 : index
    %45 = vector.load %arg9[%c0_49, %c111_50] : memref<8x640xf32, #tpu.memory_space<vmem>>, vector<8x384xf32>
    %c16_51 = arith.constant 16 : index
    %c0_52 = arith.constant 0 : index
    %46 = vector.load %arg10[%c16_51, %c0_52] : memref<80x384xf32, #tpu.memory_space<vmem>>, vector<8x384xf32>
    tpu.vector_store %arg10[%c16_51, %c0_52], %45 {strides = array<i32>} : memref<80x384xf32, #tpu.memory_space<vmem>>, vector<8x384xf32>,
    %c0_53 = arith.constant 0 : index
    %c127_54 = arith.constant 127 : index
    %47 = vector.load %arg9[%c0_53, %c127_54] : memref<8x640xf32, #tpu.memory_space<vmem>>, vector<8x384xf32>
    %c24_55 = arith.constant 24 : index
    %c0_56 = arith.constant 0 : index
    %48 = vector.load %arg10[%c24_55, %c0_56] : memref<80x384xf32, #tpu.memory_space<vmem>>, vector<8x384xf32>
    tpu.vector_store %arg10[%c24_55, %c0_56], %47 {strides = array<i32>} : memref<80x384xf32, #tpu.memory_space<vmem>>, vector<8x384xf32>,
    %c0_57 = arith.constant 0 : index
    %c128_58 = arith.constant 128 : index
    %49 = vector.load %arg9[%c0_57, %c128_58] : memref<8x640xf32, #tpu.memory_space<vmem>>, vector<8x384xf32>
    %c32_59 = arith.constant 32 : index
    %c0_60 = arith.constant 0 : index
    %50 = vector.load %arg10[%c32_59, %c0_60] : memref<80x384xf32, #tpu.memory_space<vmem>>, vector<8x384xf32>
    tpu.vector_store %arg10[%c32_59, %c0_60], %49 {strides = array<i32>} : memref<80x384xf32, #tpu.memory_space<vmem>>, vector<8x384xf32>,
    %c0_61 = arith.constant 0 : index
    %c129_62 = arith.constant 129 : index
    %51 = vector.load %arg9[%c0_61, %c129_62] : memref<8x640xf32, #tpu.memory_space<vmem>>, vector<8x384xf32>
    %c40_63 = arith.constant 40 : index
    %c0_64 = arith.constant 0 : index
    %52 = vector.load %arg10[%c40_63, %c0_64] : memref<80x384xf32, #tpu.memory_space<vmem>>, vector<8x384xf32>
    tpu.vector_store %arg10[%c40_63, %c0_64], %51 {strides = array<i32>} : memref<80x384xf32, #tpu.memory_space<vmem>>, vector<8x384xf32>,
    %c0_65 = arith.constant 0 : index
    %c145_66 = arith.constant 145 : index
    %53 = vector.load %arg9[%c0_65, %c145_66] : memref<8x640xf32, #tpu.memory_space<vmem>>, vector<8x384xf32>
    %c48_67 = arith.constant 48 : index
    %c0_68 = arith.constant 0 : index
    %54 = vector.load %arg10[%c48_67, %c0_68] : memref<80x384xf32, #tpu.memory_space<vmem>>, vector<8x384xf32>
    tpu.vector_store %arg10[%c48_67, %c0_68], %53 {strides = array<i32>} : memref<80x384xf32, #tpu.memory_space<vmem>>, vector<8x384xf32>,
    %c0_69 = arith.constant 0 : index
    %c146_70 = arith.constant 146 : index
    %55 = vector.load %arg9[%c0_69, %c146_70] : memref<8x640xf32, #tpu.memory_space<vmem>>, vector<8x384xf32>
    %c56_71 = arith.constant 56 : index
    %c0_72 = arith.constant 0 : index
    %56 = vector.load %arg10[%c56_71, %c0_72] : memref<80x384xf32, #tpu.memory_space<vmem>>, vector<8x384xf32>
    tpu.vector_store %arg10[%c56_71, %c0_72], %55 {strides = array<i32>} : memref<80x384xf32, #tpu.memory_space<vmem>>, vector<8x384xf32>,
    %c0_73 = arith.constant 0 : index
    %c147_74 = arith.constant 147 : index
    %57 = vector.load %arg9[%c0_73, %c147_74] : memref<8x640xf32, #tpu.memory_space<vmem>>, vector<8x384xf32>
    %c64_75 = arith.constant 64 : index
    %c0_76 = arith.constant 0 : index
    %58 = vector.load %arg10[%c64_75, %c0_76] : memref<80x384xf32, #tpu.memory_space<vmem>>, vector<8x384xf32>
    tpu.vector_store %arg10[%c64_75, %c0_76], %57 {strides = array<i32>} : memref<80x384xf32, #tpu.memory_space<vmem>>, vector<8x384xf32>,
    %c0_77 = arith.constant 0 : index
    %c0_78 = arith.constant 0 : index
    %c128_79 = arith.constant 128 : index
    %59 = vector.load %arg1[%c0_77, %c0_78, %c128_79] : memref<1x8x640xf32, #tpu.memory_space<vmem>>, vector<1x8x384xf32>
    %60 = vector.shape_cast %59 : vector<1x8x384xf32> to vector<8x384xf32>
    %c72 = arith.constant 72 : index
    %c0_80 = arith.constant 0 : index
    %61 = vector.load %arg10[%c72, %c0_80] : memref<80x384xf32, #tpu.memory_space<vmem>>, vector<8x384xf32>
    tpu.vector_store %arg10[%c72, %c0_80], %60 {strides = array<i32>} : memref<80x384xf32, #tpu.memory_space<vmem>>, vector<8x384xf32>,
    %c0_81 = arith.constant 0 : index
    %c0_82 = arith.constant 0 : index
    %62 = vector.load %arg5[%c0_81, %c0_82] : memref<8x80xf32, #tpu.memory_space<vmem>>, vector<8x80xf32>
    %c0_83 = arith.constant 0 : index
    %c0_84 = arith.constant 0 : index
    %63 = vector.load %arg10[%c0_83, %c0_84] : memref<80x384xf32, #tpu.memory_space<vmem>>, vector<80x384xf32>
    %cst_85 = arith.constant dense<0.000000e+00> : vector<8x384xf32>
    %64 = tpu.matmul %62, %63, %cst_85 {dimension_numbers = #tpu.dot_dimension_numbers<[1], [0], [0], [1], [0, 0, 1, 1], [], []>, precision = #tpu.contract_precision<fp32>} : vector<8x80xf32>, vector<80x384xf32>, vector<8x384xf32> -> vector<8x384xf32>
    %c0_86 = arith.constant 0 : index
    %c0_87 = arith.constant 0 : index
    %65 = vector.load %arg6[%c0_86, %c0_87] : memref<8x1xf32, #tpu.memory_space<vmem>>, vector<8x1xf32>
    %66 = vector.broadcast %65 : vector<8x1xf32> to vector<8x384xf32>
    %67 = arith.addf %64, %66 : vector<8x384xf32>
    %cst_88 = arith.constant 0.000000e+00 : f32
    %68 = vector.broadcast %cst_88 : f32 to vector<8x384xf32>
    %69 = arith.maximumf %67, %68 : vector<8x384xf32>
    %c0_89 = arith.constant 0 : index
    %c0_90 = arith.constant 0 : index
    %c0_91 = arith.constant 0 : index
    %70 = vector.load %arg7[%c0_89, %c0_90, %c0_91] : memref<1x8x384xf32, #tpu.memory_space<vmem>>, vector<1x8x384xf32>
    %71 = vector.shape_cast %70 : vector<1x8x384xf32> to vector<8x384xf32>
    %72 = vector.shape_cast %69 : vector<8x384xf32> to vector<1x8x384xf32>
    tpu.vector_store %arg7[%c0_89, %c0_90, %c0_91], %72 {strides = array<i32>} : memref<1x8x384xf32, #tpu.memory_space<vmem>>, vector<1x8x384xf32>,
    return
  }
  func.func @transform_0(%arg0: i32) -> (i32, i32, i32) {
    %c0_i32 = arith.constant 0 : i32
    %c0_i32_0 = arith.constant 0 : i32
    %c0_i32_1 = arith.constant 0 : i32
    return %arg0, %c0_i32, %c0_i32_0 : i32, i32, i32
  }
  func.func @transform_1(%arg0: i32) -> (i32, i32) {
    %c0_i32 = arith.constant 0 : i32
    %c0_i32_0 = arith.constant 0 : i32
    %c0_i32_1 = arith.constant 0 : i32
    return %c0_i32, %c0_i32_0 : i32, i32
  }
  func.func @transform_2(%arg0: i32) -> (i32, i32) {
    %c0_i32 = arith.constant 0 : i32
    %c0_i32_0 = arith.constant 0 : i32
    %c0_i32_1 = arith.constant 0 : i32
    return %c0_i32, %c0_i32_0 : i32, i32
  }
  func.func @transform_3(%arg0: i32) -> (i32, i32) {
    %c0_i32 = arith.constant 0 : i32
    %c0_i32_0 = arith.constant 0 : i32
    %c0_i32_1 = arith.constant 0 : i32
    return %c0_i32, %c0_i32_0 : i32, i32
  }
  func.func @transform_4(%arg0: i32) -> (i32, i32) {
    %c0_i32 = arith.constant 0 : i32
    %c0_i32_0 = arith.constant 0 : i32
    %c0_i32_1 = arith.constant 0 : i32
    return %c0_i32, %c0_i32_0 : i32, i32
  }
  func.func @transform_5(%arg0: i32) -> (i32, i32) {
    %c0_i32 = arith.constant 0 : i32
    %c0_i32_0 = arith.constant 0 : i32
    %c0_i32_1 = arith.constant 0 : i32
    return %c0_i32, %c0_i32_0 : i32, i32
  }
  func.func @transform_6(%arg0: i32) -> (i32, i32, i32) {
    %c0_i32 = arith.constant 0 : i32
    %c0_i32_0 = arith.constant 0 : i32
    %c0_i32_1 = arith.constant 0 : i32
    return %arg0, %c0_i32, %c0_i32_0 : i32, i32, i32
  }
}

</mosaic_0001>

<bundles_post_ra>
// kernel: tpu_custom_call.1
= control target key start
LH: loop header
LB: loop body
LE: loop exit
PB: predicated region body
PF: predicated region fallthrough
CT: control target
= control target key end

     0   :  { %11 = vsyncpa [#allocation6], 0  ;;  %s5460_s0 = inlined_call_operand.hbm [shape: f32[2,8,640], index: 0, kind: input, shape index: {}]   ;;  %s5461_s1 = inlined_call_operand.vmem [shape: f32[1,384], index: 1, kind: input, shape index: {}]   ;;  %s5462_s2 = inlined_call_operand.vmem [shape: f32[8,72], index: 2, kind: input, shape index: {}]   ;;  %s5463_s3 = inlined_call_operand.vmem [shape: f32[8,1], index: 3, kind: input, shape index: {}]   ;;  %s5464_s4 = inlined_call_operand.vmem [shape: f32[8,80], index: 4, kind: input, shape index: {}]   ;;  %s5465_s5 = inlined_call_operand.vmem [shape: f32[8,1], index: 5, kind: input, shape index: {}]   ;;  %s5466_s6 = inlined_call_operand.hbm [shape: f32[2,8,384], index: 6, kind: output, shape index: {}]  }
   0x1   :  { %13 = vsyncpa [#allocation6 + $0x1], 0 }
   0x2   :  { %14 = vsyncpa [#allocation7], 0 }
   0x3   :  { %16 = vsyncpa [#allocation7 + $0x1], 0  ;;  %s3983_s21 = smov 0   ;;  %s3985_s22 = smov 0  }
   0x4   :  { %s3987_s23 = smov 0   ;;  %s3989_s24 = smov 0  }
   0x5 LB: > { %s4004_s25 = sadd.s32 4294967295, %s3933_s24   ;;  %s3380_s26 = sadd.s32 4294967294, %s3933_s24   ;;  %s3933_s24 = sphi %s3989_s24, %s5557_s24   ;;  %s3929_s23 = sphi %s3987_s23, %s5556_s23   ;;  %s3925_s22 = sphi %s3985_s22, %s5555_s22   ;;  %s3921_s21 = sphi %s3983_s21, %s5554_s21  }
   0x6   : > { %s4008_s27 = sadd.s32 1, %s3933_s24   ;;  %s29_s28 = sadd.s32 1, %s3929_s23 }
   0x7   : > { %s26_s29 = ssub.s32 %s3933_s24, %s4008_s27  ;;  %p36_p0 = scmp.ne.s32.totalorder %s3929_s23, %s3925_s22 }
   0x8   : > { %p27_p1 = scmp.eq.s32.totalorder %s26_s29, 0  ;;  %p37_p2 = scmp.eq.s32.totalorder %s3933_s24, 0 }
   0x9   : > { %p42_p3 = scmp.ne.s32.totalorder %s3925_s22, %s3921_s21  ;;  %p43_p4 = scmp.eq.s32.totalorder %s4004_s25, 0 }
   0xa   : > { %s4020_s30 = scalar_select %p27_p1, %s3929_s23, %s29_s28  }
   0xb   : > { %p38_p5 = por %p37_p2, %p36_p0  ;;  %p4022_p6 = por %p43_p4, %p42_p3 }
   0xc   : > { %p171_p7 = scmp.eq.s32.totalorder %s4004_s25, 1  ;;  %p177_p8 = scmp.eq.s32.totalorder %s3380_s26, 1 }
   0xd   : > { %s5503_s7 = scalar_select %p4022_p6, 1, 0 }
   0xe   : > { %p3795_p10 = scmp.lt.s32.totalorder %s3933_s24, 2  ;;  %p4029_p11 = por %p171_p7, %p36_p0 }
   0xf   : > { %p4033_p12 = por %p177_p8, %p42_p3  ;;  %s212_s10 = sand.u32 1, %s3929_s23  }
  0x10   : > { %s5504_s8 = scalar_select %p4029_p11, 1, 0 }
  0x11   : > { %s5505_s9 = scalar_select %p4033_p12, 1, 0 }
  0x12   : > { %s3779_s11 = smul.u32 640, %s3933_s24  ;;  %p4044_p13 = pnand %p3795_p10, %p38_p5 }
  0x13   : > { %s3778_s12 = smul.u32 40, %s212_s10  ;;  %s213_s19 = scalar_lea.sflag [#allocation6], %s212_s10 }
  0x14   : > { %s4042_s15 = scalar_lea.hbm %s5460_s0, %s3779_s11  ;;  %p3843_p3 = pneg %p4044_p13 }
  0x15   : > { %s216_s17 = scalar_lea.vmem [#allocation5], %s3778_s12  ;;  %s3841_s20 = scalar_lea.hbm %s4042_s15, 640 }
  0x16   : > { %s224_s18 = sshll.u32 %s216_s17, 4  ;;  %p3842_p2 = scmp.ne.s32.totalorder %s4042_s15, %s3841_s20  ;;  %s225_s18 = int_to_ptr.vmem [resolvable:$true] %s224_s18 }
  0x17   : > { %s3846_s29 = scalar_lea.hbm %s5460_s0, 1280  ;;  %p3847_p5 = scmp.lt.s32.totalorder %s4042_s15, %s5460_s0 }
  0x18   : > { %p3844_p4 = pnand %p3843_p3, %p3842_p2  ;;  %p3848_p8 = scmp.lt.s32.totalorder %s3846_s29, %s3841_s20 }
  0x1a   : > { %p3845_p7 = pneg %p3844_p4  ;;  %p3849_p10 = por %p3848_p8, %p3847_p5 }
  0x1c   : > { %p3850_p9 = pnand %p3849_p10, %p3845_p7 }
  0x1e   : > { %3853 = shalt.err (!%p3850_p9)
}
  0x1f   : > { %s3854_s12 = scalar_lea.vmem %s225_s18, 640  ;;  %s3935_s10 = smov [#allocation5]  }
  0x20   : > { %p3855_p0 = scmp.ne.s32.totalorder %s225_s18, %s3854_s12  ;;  %s3859_s14 = sshll.u32 %s3935_s10, 4  ;;  %s3860_s14 = int_to_ptr.vmem [resolvable:$false] %s3859_s14 }
  0x21   : > { %s3861_s17 = scalar_lea.vmem %s3860_s14, 1280  ;;  %p3862_p2 = scmp.lt.s32.totalorder %s225_s18, %s3860_s14 }
  0x22   : > { %p3857_p1 = pnand %p3855_p0, %p3843_p3  ;;  %p3863_p4 = scmp.lt.s32.totalorder %s3861_s17, %s3854_s12 }
  0x24   : > { %p3858_p12 = pneg %p3857_p1  ;;  %p3864_p11 = por %p3863_p4, %p3862_p2 }
  0x26   : > { %p3865_p6 = pnand %p3864_p11, %p3858_p12 }
  0x28   : > { %3868 = shalt.err (!%p3865_p6)
}
  0x29   : > { %3790 = dma.hbm_to_vmem [thread:$0]  (!%p4044_p13), %s4042_s15, 640, %s225_s18, %s213_s19  }
  0x2a   : > { %p5507_p9 = scmp.lt.s32.totalorder %s3933_s24, 3  ;;  %p5508_p7 = scmp.ge.s32.totalorder %s3933_s24, 1 }
  0x2c   : > { %p230_p5 = pnand %p5508_p7, %p5507_p9 }
  0x2e   : > { %233 = sbr.rel (%p230_p5) target bundleno = 993 (0x3e1), region = 44 }
  0x33   : > { %s4069_s20 = sand.u32 1, %s3925_s22   ;;  %p5509_p6 = scmp.ne.s32.totalorder %s5503_s7, 0 }
  0x34   : > { %s3780_s26 = smul.u32 40, %s4069_s20  ;;  %s236_s28 = scalar_lea.sflag [#allocation6], %s4069_s20 }
  0x36   : > { %s4073_s29 = scalar_lea.vmem [#allocation5], %s3780_s26 }
  0x37   : > { %3912 = dma.done.wait (%p5509_p6), %s236_s28, 640  }
  0x38   : > { %3914 = vsyncadd (%p5509_p6), %s236_s28, 4294966656  ;;  %v4080_v0 = vld [vmem:[%s4073_s29 + $0x10] sm:$0xff]  ;;  %v4083_v1 = vld [vmem:[%s4073_s29 + $0x8] sm:$0xff]  ;;  %s3936_s15 = smov 109   ;;  %s3937_s7 = smov 110   ;;  %v5490_v4 = vmov 0.0  }
  0x39   : > { %466 = vrot.lane.b32.xlu0 %v4080_v0, %s3936_s15  ;;  %464 = vrot.lane.b32.xlu1 %v4083_v1, %s3936_s15  ;;  %v4090_v2 = vld [vmem:[%s4073_s29 + $0x18] sm:$0xff]  ;;  %s3938_s16 = smov 111   ;;  %s3939_s18 = smov 127   ;;  %v346_v3 = vld [vmem:[%s4073_s29] sm:$0xff]  ;;  %vm472_vm0 = vcmask 891904   ;;  %vm446_vm1 = vcmask 900096  }
  0x3a   : > { %s3940_s19 = smov 1   ;;  %s3941_s11 = smov 17   ;;  %602 = vmatprep.mubr.f32.mxu0 %v5490_v4  ;;  %768 = vmatprep.mubr.f32.mxu1 %v5490_v4  ;;  %v459_v5 = vld [vmem:[%s4073_s29 + $0x20] sm:$0xff]  ;;  %v3945_v15 = vmov 0   ;;  %vm420_vm2 = vcmask 908288   ;;  %v4200_v33 = vand.u32 4294901760, %v4080_v0 }
  0x3b   : > { %s3942_s13 = smov 18   ;;  %s3944_s12 = smov 19   ;;  %3840 = vset.pattern.permute.xlu0 %v3945_v15  ;;  %v510_v16 = vld [vmem:[%s5463_s3] sm:$0xff]  ;;  %v4207_v39 = vand.u32 4294901760, %v4083_v1  ;;  %vm394_vm3 = vcmask 1039360   ;;  %vm362_vm4 = vcmask 7168  }
  0x3c   : > { %v4222_v46 = vsub.f32 %v4080_v0, %v4200_v33  ;;  %vm516_vm5 = vcmask 588800   ;;  %v482_v63 = vld [vmem:[%s5462_s2] sm:$0xff]  ;;  %vm336_vm6 = vcmask 138240   ;;  %vm310_vm7 = vcmask 146432   ;;  %s3296_s26 = scalar_lea.sflag [#allocation7], %s4069_s20  ;;  %p5551_p12 = scmp.ne.s32.totalorder %s5504_s8, 0 }
  0x3d   : > { %468 = vrot.lane.b32.xlu0 %v4090_v2, %s3936_s15  ;;  %440 = vrot.lane.b32.xlu1 %v4080_v0, %s3937_s7  ;;  %v4229_v51 = vsub.f32 %v4083_v1, %v4207_v39  ;;  %vm284_vm8 = vcmask 154624   ;;  %vm3946_vm9 = vmmov 0   ;;  %vm2023_vm10 = vcmask 654336   ;;  %s3947_s10 = smov [#allocation8]  }
  0x3e   : > { %v5472_v58 = vand.u32 4294901760, %v4222_v46 }
  0x41   : > { %442 = vrot.lane.b32.xlu0 %v4090_v2, %s3937_s7  ;;  %438 = vrot.lane.b32.xlu1 %v4083_v1, %s3937_s7 }
  0x45   : > { %416 = vrot.lane.b32.xlu1 %v4090_v2, %s3938_s16  ;;  %414 = vrot.lane.b32.xlu0 %v4080_v0, %s3938_s16 }
  0x49   : > { %412 = vrot.lane.b32.xlu0 %v4083_v1, %s3938_s16  ;;  %388 = vrot.lane.b32.xlu1 %v4080_v0, %s3939_s18 }
  0x4d   : > { %390 = vrot.lane.b32.xlu0 %v4090_v2, %s3939_s18  ;;  %386 = vrot.lane.b32.xlu1 %v4083_v1, %s3939_s18 }
  0x51   : > { %358 = vrot.lane.b32.xlu1 %v4080_v0, %s3940_s19  ;;  %356 = vrot.lane.b32.xlu0 %v4083_v1, %s3940_s19 }
  0x55   : > { %354 = vrot.lane.b32.xlu0 %v346_v3, %s3940_s19  ;;  %330 = vrot.lane.b32.xlu1 %v4083_v1, %s3941_s11 }
  0x59   : > { %332 = vrot.lane.b32.xlu0 %v4080_v0, %s3941_s11  ;;  %328 = vrot.lane.b32.xlu1 %v346_v3, %s3941_s11 }
  0x5d   : > { %306 = vrot.lane.b32.xlu1 %v4080_v0, %s3942_s13  ;;  %304 = vrot.lane.b32.xlu0 %v4083_v1, %s3942_s13 }
  0x61   : > { %302 = vrot.lane.b32.xlu0 %v346_v3, %s3942_s13  ;;  %278 = vrot.lane.b32.xlu1 %v4083_v1, %s3944_s12 }
  0x65   : > { %280 = vrot.lane.b32.xlu0 %v4080_v0, %s3944_s12  ;;  %276 = vrot.lane.b32.xlu1 %v346_v3, %s3944_s12  ;;  %v5471_v0 = vand.u32 4294901760, %v4229_v51 }
  0x69   : > { %470 = vrot.lane.b32.xlu0 %v459_v5, %s3936_s15  ;;  %444 = vrot.lane.b32.xlu1 %v459_v5, %s3937_s7 }
  0x6d   : > { %418 = vrot.lane.b32.xlu0 %v459_v5, %s3938_s16  ;;  %392 = vrot.lane.b32.xlu1 %v459_v5, %s3939_s18 }
  0x71   : > { %360 = vrot.lane.b32.xlu0 %v4090_v2, %s3940_s19  ;;  %334 = vrot.lane.b32.xlu1 %v4090_v2, %s3941_s11 }
  0x75   : > { %308 = vrot.lane.b32.xlu0 %v4090_v2, %s3942_s13  ;;  %282 = vrot.lane.b32.xlu1 %v4090_v2, %s3944_s12 }
  0x79   : > { %513 = vperm.xlu0 %3840, %v510_v16  }
  0x7d   : > { %1857 = vrot.lane.b32.xlu0 %v5490_v4, %s3940_s19 }
  0xab   : > { %v467_v6 = vpop.permute.xlu0 %466  ;;  %v465_v7 = vpop.permute.xlu1 %464 }
  0xac   : > { %v473_v8 = vsel %vm472_vm0, %v465_v7, %v467_v6 }
  0xad   : > { %v4149_v9 = vand.u32 4294901760, %v473_v8 }
  0xaf   : > { %v4152_v10 = vsub.f32 %v473_v8, %v4149_v9  ;;  %v4154_v11 = vpop.permute.xlu0 %468  ;;  %v441_v12 = vpop.permute.xlu1 %440 }
  0xb0   : > { %v474_v13 = vsel %vm472_vm0, %v467_v6, %v4154_v11 }
  0xb1   : > { %v4158_v14 = vand.u32 4294901760, %v474_v13  ;;  %v636_v17 = vand.u32 4294901760, %v4152_v10 }
  0xb3   : > { %v4165_v18 = vsub.f32 %v474_v13, %v4158_v14  ;;  %535 = vmatprep.subr.mxu0 %v4158_v14  ;;  %v4168_v19 = vpop.permute.xlu0 %442  ;;  %v439_v20 = vpop.permute.xlu1 %438  ;;  %v637_v26 = vsub.f32 %v4152_v10, %v636_v17  ;;  %v518_v13 = vsel %vm516_vm5, %v482_v63, 0 }
  0xb4   : > { %v448_v21 = vsel %vm446_vm1, %v441_v12, %v4168_v19  ;;  %v447_v22 = vsel %vm446_vm1, %v439_v20, %v441_v12  ;;  %537 = vmatpush1.msra.mxu0 %v4149_v9  ;;  %v679_v12 = vsub.f32 %v4222_v46, %v5472_v58 }
  0xb5   : > { %v4174_v23 = vand.u32 4294901760, %v448_v21  ;;  %v4176_v24 = vand.u32 4294901760, %v447_v22  ;;  %v630_v25 = vand.u32 4294901760, %v4165_v18  ;;  %v638_v38 = vand.u32 4294901760, %v637_v26 }
  0xb7   : > { %v4185_v27 = vsub.f32 %v448_v21, %v4174_v23  ;;  %v4188_v28 = vsub.f32 %v447_v22, %v4176_v24  ;;  %539 = vmatprep.subr.mxu0 %v4174_v23  ;;  %v4191_v29 = vpop.permute.xlu1 %416  ;;  %v415_v30 = vpop.permute.xlu0 %414  ;;  %v631_v31 = vsub.f32 %v4165_v18, %v630_v25  ;;  %v685_v22 = vsub.f32 %v4229_v51, %v5471_v0 }
  0xb8   : > { %v422_v32 = vsel %vm420_vm2, %v415_v30, %v4191_v29  ;;  %541 = vmatpush1.msra.mxu0 %v4176_v24 }
  0xb9   : > { %v4202_v34 = vand.u32 4294901760, %v422_v32  ;;  %v632_v35 = vand.u32 4294901760, %v631_v31  ;;  %v642_v36 = vand.u32 4294901760, %v4185_v27  ;;  %v648_v37 = vand.u32 4294901760, %v4188_v28 }
  0xbb   : > { %v4210_v40 = vsub.f32 %v422_v32, %v4202_v34  ;;  %543 = vmatprep.subr.mxu0 %v4202_v34  ;;  %633 = vmatprep.subr.mxu1 %v632_v35  ;;  %v413_v41 = vpop.permute.xlu0 %412  ;;  %v389_v42 = vpop.permute.xlu1 %388  ;;  %v643_v43 = vsub.f32 %v4185_v27, %v642_v36  ;;  %v649_v44 = vsub.f32 %v4188_v28, %v648_v37 }
  0xbc   : > { %v421_v45 = vsel %vm420_vm2, %v413_v41, %v415_v30  ;;  %639 = vmatpush1.msra.mxu1 %v638_v38  ;;  %v680_v41 = vand.u32 4294901760, %v679_v12 }
  0xbd   : > { %v4224_v47 = vand.u32 4294901760, %v421_v45  ;;  %v644_v48 = vand.u32 4294901760, %v643_v43  ;;  %v650_v49 = vand.u32 4294901760, %v649_v44  ;;  %v654_v50 = vand.u32 4294901760, %v4210_v40 }
  0xbf   : > { %v4232_v52 = vsub.f32 %v421_v45, %v4224_v47  ;;  %545 = vmatpush1.msra.mxu0 %v4224_v47  ;;  %645 = vmatprep.subr.mxu1 %v644_v48  ;;  %v4235_v53 = vpop.permute.xlu0 %390  ;;  %v387_v54 = vpop.permute.xlu1 %386  ;;  %v655_v55 = vsub.f32 %v4210_v40, %v654_v50 }
  0xc0   : > { %v396_v56 = vsel %vm394_vm3, %v389_v42, %v4235_v53  ;;  %v395_v57 = vsel %vm394_vm3, %v387_v54, %v389_v42  ;;  %651 = vmatpush1.msra.mxu1 %v650_v49  ;;  %v4292_v42 = vand.u32 4294901760, %v518_v13  ;;  %v686_v49 = vand.u32 4294901760, %v685_v22 }
  0xc1   : > { %v4244_v59 = vand.u32 4294901760, %v396_v56  ;;  %v4246_v60 = vand.u32 4294901760, %v395_v57  ;;  %v656_v61 = vand.u32 4294901760, %v655_v55  ;;  %v5477_v62 = vand.u32 4294901760, %v4232_v52 }
  0xc3   : > { %v4254_v1 = vsub.f32 %v396_v56, %v4244_v59  ;;  %v4257_v3 = vsub.f32 %v395_v57, %v4246_v60  ;;  %547 = vmatprep.subr.mxu0 %v4244_v59  ;;  %657 = vmatprep.subr.mxu1 %v656_v61  ;;  %v4260_v5 = vpop.permute.xlu1 %358  ;;  %v357_v6 = vpop.permute.xlu0 %356  ;;  %v661_v7 = vsub.f32 %v4232_v52, %v5477_v62 }
  0xc4   : > { %v364_v8 = vsel %vm362_vm4, %v357_v6, %v4260_v5  ;;  %549 = vmatpush1.msra.mxu0 %v4246_v60 }
  0xc5   : > { %v4272_v15 = vand.u32 4294901760, %v364_v8  ;;  %551 = vmatprep.subr.mxu0 %v4200_v33  ;;  %v662_v16 = vand.u32 4294901760, %v661_v7  ;;  %v5476_v20 = vand.u32 4294901760, %v4254_v1  ;;  %v5475_v21 = vand.u32 4294901760, %v4257_v3 }
  0xc6   : > { %553 = vmatpush1.msra.mxu0 %v4207_v39 }
  0xc7   : > { %v4282_v26 = vsub.f32 %v364_v8, %v4272_v15  ;;  %555 = vmatprep.subr.mxu0 %v4272_v15  ;;  %663 = vmatpush1.msra.mxu1 %v662_v16  ;;  %v355_v30 = vpop.permute.xlu0 %354  ;;  %v331_v31 = vpop.permute.xlu1 %330  ;;  %v667_v32 = vsub.f32 %v4254_v1, %v5476_v20  ;;  %v673_v35 = vsub.f32 %v4257_v3, %v5475_v21 }
  0xc8   : > { %v363_v38 = vsel %vm362_vm4, %v355_v30, %v357_v6  ;;  %v4310_v6 = vsub.f32 %v518_v13, %v4292_v42 }
  0xc9   : > { %v4294_v43 = vand.u32 4294901760, %v363_v38  ;;  %v668_v44 = vand.u32 4294901760, %v667_v32  ;;  %v674_v45 = vand.u32 4294901760, %v673_v35  ;;  %v5470_v48 = vand.u32 4294901760, %v4282_v26 }
  0xcb   : > { %v4298_v54 = vsub.f32 %v363_v38, %v4294_v43  ;;  %557 = vmatpush1.msra.mxu0 %v4294_v43  ;;  %669 = vmatprep.subr.mxu1 %v668_v44  ;;  %v4301_v55 = vpop.permute.xlu0 %332  ;;  %v329_v56 = vpop.permute.xlu1 %328  ;;  %v691_v57 = vsub.f32 %v4282_v26, %v5470_v48  ;;  %v4333_v38 = vand.u32 4294901760, %v4310_v6 }
  0xcc   : > { %v338_v61 = vsel %vm336_vm6, %v331_v31, %v4301_v55  ;;  %v337_v63 = vsel %vm336_vm6, %v329_v56, %v331_v31  ;;  %675 = vmatpush1.msra.mxu1 %v674_v45 }
  0xcd   : > { %v4312_v7 = vand.u32 4294901760, %v338_v61  ;;  %v4314_v8 = vand.u32 4294901760, %v337_v63  ;;  %681 = vmatprep.subr.mxu1 %v680_v41  ;;  %v692_v12 = vand.u32 4294901760, %v691_v57  ;;  %v5469_v16 = vand.u32 4294901760, %v4298_v54 }
  0xce   : > { %687 = vmatpush1.msra.mxu1 %v686_v49 }
  0xcf   : > { %v4318_v22 = vsub.f32 %v338_v61, %v4312_v7  ;;  %v4321_v30 = vsub.f32 %v337_v63, %v4314_v8  ;;  %559 = vmatprep.subr.mxu0 %v4312_v7  ;;  %693 = vmatprep.subr.mxu1 %v692_v12  ;;  %v4324_v13 = vpop.permute.xlu1 %306  ;;  %v305_v31 = vpop.permute.xlu0 %304  ;;  %v697_v32 = vsub.f32 %v4298_v54, %v5469_v16 }
  0xd0   : > { %v312_v35 = vsel %vm310_vm7, %v305_v31, %v4324_v13  ;;  %561 = vmatpush1.msra.mxu0 %v4314_v8 }
  0xd1   : > { %v4335_v41 = vand.u32 4294901760, %v312_v35  ;;  %v698_v44 = vand.u32 4294901760, %v697_v32  ;;  %v5473_v45 = vand.u32 4294901760, %v4318_v22  ;;  %v5474_v49 = vand.u32 4294901760, %v4321_v30 }
  0xd3   : > { %v4340_v56 = vsub.f32 %v312_v35, %v4335_v41  ;;  %563 = vmatprep.subr.mxu0 %v4335_v41  ;;  %699 = vmatpush1.msra.mxu1 %v698_v44  ;;  %v303_v57 = vpop.permute.xlu0 %302  ;;  %v279_v61 = vpop.permute.xlu1 %278  ;;  %v703_v63 = vsub.f32 %v4318_v22, %v5473_v45  ;;  %v709_v12 = vsub.f32 %v4321_v30, %v5474_v49 }
  0xd4   : > { %v311_v32 = vsel %vm310_vm7, %v303_v57, %v305_v31  ;;  %v606_v35 = vsub.f32 %v4310_v6, %v4333_v38 }
  0xd5   : > { %v4352_v16 = vand.u32 4294901760, %v311_v32  ;;  %v704_v48 = vand.u32 4294901760, %v703_v63  ;;  %v710_v44 = vand.u32 4294901760, %v709_v12  ;;  %v5478_v0 = vand.u32 4294901760, %v4340_v56 }
  0xd6   : > { %v4367_v12 = vand.u32 4294901760, %v606_v35 }
  0xd7   : > { %v4356_v58 = vsub.f32 %v311_v32, %v4352_v16  ;;  %565 = vmatpush1.msra.mxu0 %v4352_v16  ;;  %705 = vmatprep.subr.mxu1 %v704_v48  ;;  %v4359_v45 = vpop.permute.xlu0 %280  ;;  %v277_v49 = vpop.permute.xlu1 %276  ;;  %v715_v31 = vsub.f32 %v4340_v56, %v5478_v0 }
  0xd8   : > { %v286_v57 = vsel %vm284_vm8, %v279_v61, %v4359_v45  ;;  %v285_v63 = vsel %vm284_vm8, %v277_v49, %v279_v61  ;;  %711 = vmatpush1.msra.mxu1 %v710_v44 }
  0xd9   : > { %v4369_v32 = vand.u32 4294901760, %v286_v57  ;;  %v4371_v21 = vand.u32 4294901760, %v285_v63  ;;  %v716_v48 = vand.u32 4294901760, %v715_v31  ;;  %v720_v20 = vand.u32 4294901760, %v4356_v58 }
  0xdb   : > { %v4375_v62 = vsub.f32 %v286_v57, %v4369_v32  ;;  %v4378_v0 = vsub.f32 %v285_v63, %v4371_v21  ;;  %717 = vmatprep.subr.mxu1 %v716_v48  ;;  %567 = vmatprep.subr.mxu0 %v4369_v32  ;;  %v721_v49 = vsub.f32 %v4356_v58, %v720_v20 }
  0xdc   : > { %569 = vmatpush1.msra.mxu0 %v4371_v21 }
  0xdd   : > { %792 = vmatprep.subr.mxu0 %v4165_v18  ;;  %608 = vmatmul.mubr.f32.vlgmr.msra.gmra.mxu0 %v4367_v12  ;;  %v722_v61 = vand.u32 4294901760, %v721_v49  ;;  %v726_v35 = vand.u32 4294901760, %v4375_v62  ;;  %v732_v44 = vand.u32 4294901760, %v4378_v0  ;;  %v471_v49 = vpop.permute.xlu0 %470  ;;  %v445_v18 = vpop.permute.xlu1 %444 }
  0xde   : > { %795 = vmatpush1.msra.mxu0 %v4152_v10  ;;  %876 = vmatprep.mubr.f32.mxu0 %v5490_v4  ;;  %v5510_v10 = vand.u32 4294901760, %v4232_v52 }
  0xdf   : > { %723 = vmatpush1.msra.mxu1 %v722_v61  ;;  %798 = vmatprep.subr.mxu0 %v4185_v27  ;;  %v727_v31 = vsub.f32 %v4375_v62, %v726_v35  ;;  %v733_v57 = vsub.f32 %v4378_v0, %v732_v44 }
  0xe0   : > { %801 = vmatpush1.msra.mxu0 %v4188_v28  ;;  %v5513_v28 = vand.u32 4294901760, %v4222_v46 }
  0xe1   : > { %804 = vmatprep.subr.mxu0 %v4210_v40  ;;  %v728_v63 = vand.u32 4294901760, %v727_v31  ;;  %v734_v48 = vand.u32 4294901760, %v733_v57  ;;  %v419_v27 = vpop.permute.xlu0 %418  ;;  %v393_v40 = vpop.permute.xlu1 %392 }
  0xe2   : > { %807 = vmatpush1.msra.mxu0 %v4232_v52  ;;  %v449_v52 = vsel %vm446_vm1, %v4168_v19, %v445_v18 }
  0xe3   : > { %810 = vmatprep.subr.mxu0 %v4254_v1  ;;  %729 = vmatprep.subr.mxu1 %v728_v63  ;;  %v4476_v19 = vand.u32 4294901760, %v449_v52 }
  0xe4   : > { %813 = vmatpush1.msra.mxu0 %v4257_v3  ;;  %735 = vmatpush1.msra.mxu1 %v734_v48 }
  0xe5   : > { %816 = vmatprep.subr.mxu0 %v4222_v46  ;;  %770 = vmatmul.mubr.f32.vlgmr.msra.gmra.mxu1 %v4292_v42  ;;  %v5516_v46 = vand.u32 4294901760, %v4298_v54 }
  0xe6   : > { %900 = vmatprep.subr.mxu1 %v4158_v14  ;;  %819 = vmatpush1.msra.mxu0 %v4229_v51 }
  0xe7   : > { %902 = vmatpush1.msra.mxu1 %v4149_v9  ;;  %822 = vmatprep.subr.mxu0 %v4282_v26 }
  0xe8   : > { %904 = vmatprep.subr.mxu1 %v4174_v23  ;;  %825 = vmatpush1.msra.mxu0 %v4298_v54 }
  0xe9   : > { %906 = vmatpush1.msra.mxu1 %v4176_v24  ;;  %828 = vmatprep.subr.mxu0 %v4318_v22 }
  0xea   : > { %908 = vmatprep.subr.mxu1 %v4202_v34  ;;  %831 = vmatpush1.msra.mxu0 %v4321_v30 }
  0xeb   : > { %910 = vmatpush1.msra.mxu1 %v4224_v47  ;;  %834 = vmatprep.subr.mxu0 %v4340_v56 }
  0xec   : > { %912 = vmatprep.subr.mxu1 %v4244_v59  ;;  %837 = vmatpush1.msra.mxu0 %v4356_v58 }
  0xed   : > { %914 = vmatpush1.msra.mxu1 %v4246_v60  ;;  %840 = vmatprep.subr.mxu0 %v4375_v62 }
  0xee   : > { %916 = vmatprep.subr.mxu1 %v4200_v33  ;;  %843 = vmatpush1.msra.mxu0 %v4378_v0 }
  0xef   : > { %918 = vmatpush1.msra.mxu1 %v4207_v39  ;;  %879 = vmatmul.mubr.f32.vlgmr.msra.gmra.mxu0 %v4310_v6 }
  0xf0   : > { %920 = vmatprep.subr.mxu1 %v4272_v15  ;;  %994 = vmatprep.subr.mxu0 %v630_v25  ;;  %v5512_v25 = vand.u32 4294901760, %v4257_v3  ;;  %v335_v3 = vpop.permute.xlu1 %334 }
  0xf1   : > { %922 = vmatpush1.msra.mxu1 %v4294_v43  ;;  %998 = vmatpush1.msra.mxu0 %v636_v17  ;;  %v5511_v17 = vand.u32 4294901760, %v4254_v1  ;;  %v5519_v1 = vand.u32 4294901760, %v4340_v56 }
  0xf2   : > { %924 = vmatprep.subr.mxu1 %v4312_v7  ;;  %1002 = vmatprep.subr.mxu0 %v642_v36  ;;  %v475_v36 = vsel %vm472_vm0, %v4154_v11, %v471_v49 }
  0xf3   : > { %926 = vmatpush1.msra.mxu1 %v4314_v8  ;;  %1006 = vmatpush1.msra.mxu0 %v648_v37  ;;  %v5514_v37 = vand.u32 4294901760, %v4229_v51  ;;  %v4466_v11 = vand.u32 4294901760, %v475_v36  ;;  %v5518_v51 = vand.u32 4294901760, %v4321_v30 }
  0xf4   : > { %928 = vmatprep.subr.mxu1 %v4335_v41  ;;  %1010 = vmatprep.subr.mxu0 %v654_v50  ;;  %v5515_v50 = vand.u32 4294901760, %v4282_v26  ;;  %v283_v26 = vpop.permute.xlu1 %282 }
  0xf5   : > { %930 = vmatpush1.msra.mxu1 %v4352_v16  ;;  %1014 = vmatpush1.msra.mxu0 %v5510_v10 }
  0xf6   : > { %932 = vmatprep.subr.mxu1 %v4369_v32  ;;  %1018 = vmatprep.subr.mxu0 %v5511_v17 }
  0xf7   : > { %934 = vmatpush1.msra.mxu1 %v4371_v21  ;;  %967 = vmatprep.mubr.f32.mxu1 %v5490_v4 }
  0xf8   : > { %1022 = vmatpush1.msra.mxu0 %v5512_v25  ;;  %971 = vmatmul.mubr.f32.vlgmr.msra.gmra.mxu1 %v4333_v38 }
  0xf9   : > { %1026 = vmatprep.subr.mxu0 %v5513_v28  ;;  %1118 = vmatprep.subr.mxu1 %v4158_v14  ;;  %v5517_v14 = vand.u32 4294901760, %v4318_v22 }
  0xfa   : > { %1030 = vmatpush1.msra.mxu0 %v5514_v37  ;;  %1120 = vmatpush1.msra.mxu1 %v4149_v9  ;;  %v423_v9 = vsel %vm420_vm2, %v4191_v29, %v419_v27  ;;  %v4487_v29 = vsub.f32 %v475_v36, %v4466_v11 }
  0xfb   : > { %1034 = vmatprep.subr.mxu0 %v5515_v50  ;;  %1122 = vmatprep.subr.mxu1 %v4174_v23  ;;  %v361_v23 = vpop.permute.xlu0 %360 }
  0xfc   : > { %1038 = vmatpush1.msra.mxu0 %v5516_v46  ;;  %1124 = vmatpush1.msra.mxu1 %v4176_v24  ;;  %v397_v24 = vsel %vm394_vm3, %v4235_v53, %v393_v40  ;;  %v4501_v53 = vsub.f32 %v449_v52, %v4476_v19 }
  0xfd   : > { %1042 = vmatprep.subr.mxu0 %v5517_v14  ;;  %1126 = vmatprep.subr.mxu1 %v4202_v34  ;;  %v4489_v34 = vand.u32 4294901760, %v423_v9  ;;  %v4503_v58 = vand.u32 4294901760, %v397_v24  ;;  %v1748_v14 = vlaneseq }
  0xfe   : > { %1046 = vmatpush1.msra.mxu0 %v5518_v51  ;;  %1128 = vmatpush1.msra.mxu1 %v4224_v47  ;;  %v4498_v47 = vand.u32 4294901760, %v4090_v2 }
  0xff   : > { %1050 = vmatprep.subr.mxu0 %v5519_v1  ;;  %1130 = vmatprep.subr.mxu1 %v4244_v59  ;;  %v365_v59 = vsel %vm362_vm4, %v4260_v5, %v361_v23  ;;  %v309_v62 = vpop.permute.xlu0 %308  ;;  %v1301_v5 = vand.u32 4294901760, %v4501_v53  ;;  %v4720_v23 = vshrl.u32 %v1748_v14, 7 }
 0x100   : > { %1054 = vmatpush1.msra.mxu0 %v720_v20  ;;  %1132 = vmatpush1.msra.mxu1 %v4246_v60  ;;  %v4513_v60 = vsub.f32 %v423_v9, %v4489_v34  ;;  %v4523_v0 = vsub.f32 %v4090_v2, %v4498_v47  ;;  %v4529_v20 = vand.u32 4294901760, %v365_v59 }
 0x101   : > { %1058 = vmatprep.subr.mxu0 %v726_v35  ;;  %1134 = vmatprep.subr.mxu1 %v4200_v33  ;;  %v1294_v33 = vand.u32 4294901760, %v4487_v29  ;;  %v1302_v22 = vsub.f32 %v4501_v53, %v1301_v5 }
 0x102   : > { %1062 = vmatpush1.msra.mxu0 %v732_v44  ;;  %1095 = vmatprep.mubr.f32.mxu0 %v5490_v4  ;;  %v1308_v54 = vand.u32 4294901760, %v4513_v60 }
 0x103   : > { %1136 = vmatpush1.msra.mxu1 %v4207_v39  ;;  %1097 = vmatmul.mubr.f32.vlgmr.msra.gmra.mxu0 %v4292_v42  ;;  %v339_v39 = vsel %vm336_vm6, %v4301_v55, %v335_v3  ;;  %v1295_v2 = vsub.f32 %v4487_v29, %v1294_v33  ;;  %v1303_v31 = vand.u32 4294901760, %v1302_v22 }
 0x104   : > { %1138 = vmatprep.subr.mxu1 %v4272_v15  ;;  %3514 = vmatprep.subr.mxu0 %v5490_v4  ;;  %v4527_v15 = vsub.f32 %v397_v24, %v4503_v58  ;;  %v4541_v55 = vand.u32 4294901760, %v339_v39 }
 0x105   : > { %1140 = vmatpush1.msra.mxu1 %v4294_v43  ;;  %3515 = vmatpush3.msra.mxu0 %v4466_v11  ;;  %v313_v43 = vsel %vm310_vm7, %v4324_v13, %v309_v62  ;;  %v4555_v13 = vsub.f32 %v365_v59, %v4529_v20 }
 0x106   : > { %1142 = vmatprep.subr.mxu1 %v4312_v7  ;;  %3516 = vmatprep.subr.mxu0 %v5490_v4  ;;  %v287_v7 = vsel %vm284_vm8, %v4359_v45, %v283_v26  ;;  %v1315_v30 = vand.u32 4294901760, %v4527_v15  ;;  %v4567_v45 = vsub.f32 %v339_v39, %v4541_v55 }
 0x107   : > { %1144 = vmatpush1.msra.mxu1 %v4314_v8  ;;  %3517 = vmatpush3.msra.mxu0 %v4476_v19  ;;  %v1322_v8 = vand.u32 4294901760, %v4523_v0  ;;  %v4569_v56 = vand.u32 4294901760, %v287_v7  ;;  %v1329_v35 = vand.u32 4294901760, %v4555_v13 }
 0x108   : > { %1146 = vmatprep.subr.mxu1 %v4335_v41  ;;  %3518 = vmatprep.subr.mxu0 %v5490_v4  ;;  %v4557_v41 = vand.u32 4294901760, %v313_v43  ;;  %v1316_v61 = vsub.f32 %v4527_v15, %v1315_v30  ;;  %v1336_v57 = vand.u32 4294901760, %v4567_v45 }
 0x109   : > { %1148 = vmatpush1.msra.mxu1 %v4352_v16  ;;  %3519 = vmatpush3.msra.mxu0 %v4489_v34  ;;  %v1309_v16 = vsub.f32 %v4513_v60, %v1308_v54  ;;  %v4590_v63 = vsub.f32 %v287_v7, %v4569_v56  ;;  %v1330_v49 = vsub.f32 %v4555_v13, %v1329_v35 }
 0x10a   : > { %1150 = vmatprep.subr.mxu1 %v4369_v32  ;;  %3520 = vmatprep.subr.mxu0 %v5490_v4  ;;  %v1296_v32 = vand.u32 4294901760, %v1295_v2  ;;  %v4583_v44 = vsub.f32 %v313_v43, %v4557_v41  ;;  %v1317_v10 = vand.u32 4294901760, %v1316_v61  ;;  %v1337_v25 = vsub.f32 %v4567_v45, %v1336_v57 }
 0x10b   : > { %1152 = vmatpush1.msra.mxu1 %v4371_v21  ;;  %1185 = vmatprep.mubr.f32.mxu1 %v5490_v4  ;;  %v1323_v21 = vsub.f32 %v4523_v0, %v1322_v8  ;;  %v1310_v48 = vand.u32 4294901760, %v1309_v16  ;;  %v1350_v27 = vand.u32 4294901760, %v4590_v63  ;;  %v1331_v36 = vand.u32 4294901760, %v1330_v49 }
 0x10c   : > { %3521 = vmatpush3.msra.mxu0 %v4503_v58  ;;  %1187 = vmatmul.mubr.f32.vlgmr.msra.gmra.mxu1 %v4292_v42  ;;  %v1343_v18 = vand.u32 4294901760, %v4583_v44  ;;  %v1338_v40 = vand.u32 4294901760, %v1337_v25 }
 0x10d   : > { %3522 = vmatprep.subr.mxu0 %v5490_v4  ;;  %3535 = vmatprep.subr.mxu1 %v5490_v4  ;;  %v1324_v17 = vand.u32 4294901760, %v1323_v21  ;;  %v1351_v37 = vsub.f32 %v4590_v63, %v1350_v27 }
 0x10e   : > { %3523 = vmatpush3.msra.mxu0 %v4498_v47  ;;  %3536 = vmatpush3.msra.mxu1 %v1296_v32  ;;  %v1344_v28 = vsub.f32 %v4583_v44, %v1343_v18 }
 0x10f   : > { %3524 = vmatprep.subr.mxu0 %v5490_v4  ;;  %3537 = vmatprep.subr.mxu1 %v5490_v4  ;;  %v1352_v52 = vand.u32 4294901760, %v1351_v37 }
 0x110   : > { %3525 = vmatpush3.msra.mxu0 %v4529_v20  ;;  %3538 = vmatpush3.msra.mxu1 %v1303_v31  ;;  %v1345_v50 = vand.u32 4294901760, %v1344_v28 }
 0x111   : > { %3526 = vmatprep.subr.mxu0 %v5490_v4  ;;  %3539 = vmatprep.subr.mxu1 %v5490_v4 }
 0x112   : > { %3527 = vmatpush3.msra.mxu0 %v4541_v55  ;;  %3540 = vmatpush3.msra.mxu1 %v1310_v48 }
 0x113   : > { %3528 = vmatprep.subr.mxu0 %v5490_v4  ;;  %3541 = vmatprep.subr.mxu1 %v5490_v4 }
 0x114   : > { %3529 = vmatpush3.msra.mxu0 %v4557_v41  ;;  %3542 = vmatpush3.msra.mxu1 %v1317_v10 }
 0x115   : > { %3530 = vmatprep.subr.mxu0 %v5490_v4  ;;  %3543 = vmatprep.subr.mxu1 %v5490_v4 }
 0x116   : > { %3531 = vmatpush3.msra.mxu0 %v4569_v56  ;;  %3544 = vmatpush3.msra.mxu1 %v1324_v17 }
 0x117   : > { %3532 = vmatprep.mubr.msk.f32.mxu0 %vm3946_vm9, %v5490_v4  ;;  %3545 = vmatprep.subr.mxu1 %v5490_v4 }
 0x118   : > { %3556 = vmatprep.subr.mxu0 %v5490_v4  ;;  %3533 = vmatmul.mubr.f32.vlgmr.msra.gmra.mxu0 %v4367_v12 }
 0x119   : > { %3546 = vmatpush3.msra.mxu1 %v1331_v36  ;;  %3557 = vmatpush3.msra.mxu0 %v4487_v29 }
 0x11a   : > { %3547 = vmatprep.subr.mxu1 %v5490_v4  ;;  %3558 = vmatprep.subr.mxu0 %v5490_v4 }
 0x11b   : > { %3548 = vmatpush3.msra.mxu1 %v1338_v40  ;;  %3559 = vmatpush3.msra.mxu0 %v4501_v53 }
 0x11c   : > { %3549 = vmatprep.subr.mxu1 %v5490_v4  ;;  %3560 = vmatprep.subr.mxu0 %v5490_v4 }
 0x11d   : > { %3550 = vmatpush3.msra.mxu1 %v1345_v50  ;;  %3561 = vmatpush3.msra.mxu0 %v4513_v60 }
 0x11e   : > { %3551 = vmatprep.subr.mxu1 %v5490_v4  ;;  %3562 = vmatprep.subr.mxu0 %v5490_v4 }
 0x11f   : > { %3552 = vmatpush3.msra.mxu1 %v1352_v52  ;;  %3553 = vmatprep.mubr.msk.f32.mxu1 %vm3946_vm9, %v5490_v4 }
 0x120   : > { %3563 = vmatpush3.msra.mxu0 %v4527_v15  ;;  %3554 = vmatmul.mubr.f32.vlgmr.msra.gmra.mxu1 %v4292_v42 }
 0x121   : > { %3564 = vmatprep.subr.mxu0 %v5490_v4  ;;  %3577 = vmatprep.subr.mxu1 %v5490_v4 }
 0x122   : > { %3565 = vmatpush3.msra.mxu0 %v4523_v0  ;;  %3578 = vmatpush3.msra.mxu1 %v4466_v11 }
 0x123   : > { %3566 = vmatprep.subr.mxu0 %v5490_v4  ;;  %3579 = vmatprep.subr.mxu1 %v5490_v4 }
 0x124   : > { %3567 = vmatpush3.msra.mxu0 %v4555_v13  ;;  %3580 = vmatpush3.msra.mxu1 %v4476_v19 }
 0x125   : > { %3568 = vmatprep.subr.mxu0 %v5490_v4  ;;  %3581 = vmatprep.subr.mxu1 %v5490_v4 }
 0x126   : > { %3569 = vmatpush3.msra.mxu0 %v4567_v45  ;;  %3582 = vmatpush3.msra.mxu1 %v4489_v34 }
 0x127   : > { %3570 = vmatprep.subr.mxu0 %v5490_v4  ;;  %3583 = vmatprep.subr.mxu1 %v5490_v4 }
 0x128   : > { %3571 = vmatpush3.msra.mxu0 %v4583_v44  ;;  %3584 = vmatpush3.msra.mxu1 %v4503_v58  ;;  %v1981_v44 = vld [vmem:[%s4073_s29 + $0x10] sm:$0xff] }
 0x129   : > { %3572 = vmatprep.subr.mxu0 %v5490_v4  ;;  %3585 = vmatprep.subr.mxu1 %v5490_v4 }
 0x12a   : > { %3573 = vmatpush3.msra.mxu0 %v4590_v63  ;;  %3574 = vmatprep.mubr.msk.f32.mxu0 %vm3946_vm9, %v5490_v4  ;;  %v1980_v63 = vld [vmem:[%s4073_s29 + $0x8] sm:$0xff] }
 0x12b   : > { %3586 = vmatpush3.msra.mxu1 %v4498_v47  ;;  %3575 = vmatmul.mubr.f32.vlgmr.msra.gmra.mxu0 %v4310_v6  ;;  %v4759_v49 = vand.u32 4294901760, %v1980_v63 }
 0x12c   : > { %3587 = vmatprep.subr.mxu1 %v5490_v4  ;;  %3598 = vmatprep.subr.mxu0 %v5490_v4 }
 0x12d   : > { %3588 = vmatpush3.msra.mxu1 %v4529_v20  ;;  %3599 = vmatpush3.msra.mxu0 %v1294_v33  ;;  %v4767_v17 = vsub.f32 %v1980_v63, %v4759_v49 }
 0x12e   : > { %3589 = vmatprep.subr.mxu1 %v5490_v4  ;;  %3600 = vmatprep.subr.mxu0 %v5490_v4 }
 0x12f   : > { %3590 = vmatpush3.msra.mxu1 %v4541_v55  ;;  %3601 = vmatpush3.msra.mxu0 %v1301_v5  ;;  %v5486_v36 = vand.u32 4294901760, %v4767_v17 }
 0x130   : > { %3591 = vmatprep.subr.mxu1 %v5490_v4  ;;  %3602 = vmatprep.subr.mxu0 %v5490_v4 }
 0x131   : > { %3592 = vmatpush3.msra.mxu1 %v4557_v41  ;;  %3603 = vmatpush3.msra.mxu0 %v1308_v54  ;;  %v2144_v52 = vsub.f32 %v4767_v17, %v5486_v36 }
 0x132   : > { %3593 = vmatprep.subr.mxu1 %v5490_v4  ;;  %3604 = vmatprep.subr.mxu0 %v5490_v4 }
 0x133   : > { %3594 = vmatpush3.msra.mxu1 %v4569_v56  ;;  %3595 = vmatprep.mubr.msk.f32.mxu1 %vm3946_vm9, %v5490_v4 }
 0x134   : > { %3605 = vmatpush3.msra.mxu0 %v1315_v30  ;;  %3596 = vmatmul.mubr.f32.vlgmr.msra.gmra.mxu1 %v4333_v38  ;;  %v514_v38 = vpop.permute.xlu0 %513 }
 0x135   : > { %3606 = vmatprep.subr.mxu0 %v5490_v4  ;;  %3619 = vmatprep.subr.mxu1 %v5490_v4 }
 0x136   : > { %3607 = vmatpush3.msra.mxu0 %v1322_v8  ;;  %3620 = vmatpush3.msra.mxu1 %v4466_v11 }
 0x137   : > { %3608 = vmatprep.subr.mxu0 %v5490_v4  ;;  %3621 = vmatprep.subr.mxu1 %v5490_v4 }
 0x138   : > { %3609 = vmatpush3.msra.mxu0 %v1329_v35  ;;  %3622 = vmatpush3.msra.mxu1 %v4476_v19 }
 0x139   : > { %3610 = vmatprep.subr.mxu0 %v5490_v4  ;;  %3623 = vmatprep.subr.mxu1 %v5490_v4 }
 0x13a   : > { %3611 = vmatpush3.msra.mxu0 %v1336_v57  ;;  %3624 = vmatpush3.msra.mxu1 %v4489_v34  ;;  %v4756_v57 = vand.u32 4294901760, %v1981_v44 }
 0x13b   : > { %3612 = vmatprep.subr.mxu0 %v5490_v4  ;;  %3625 = vmatprep.subr.mxu1 %v5490_v4 }
 0x13c   : > { %3613 = vmatpush3.msra.mxu0 %v1343_v18  ;;  %3626 = vmatpush3.msra.mxu1 %v4503_v58  ;;  %v1746_v58 = vld [vmem:[%s5461_s1] sm:$0x7]  ;;  %v4763_v10 = vsub.f32 %v1981_v44, %v4756_v57 }
 0x13d   : > { %3614 = vmatprep.subr.mxu0 %v5490_v4  ;;  %3627 = vmatprep.subr.mxu1 %v5490_v4 }
 0x13e   : > { %3615 = vmatpush3.msra.mxu0 %v1350_v27  ;;  %3616 = vmatprep.mubr.msk.f32.mxu0 %vm3946_vm9, %v5490_v4  ;;  %v1758_v27 = vsub.s32 2, %v4720_v23  ;;  %v5487_v28 = vand.u32 4294901760, %v4763_v10 }
 0x13f   : > { %3628 = vmatpush3.msra.mxu1 %v4498_v47  ;;  %3617 = vmatmul.mubr.f32.vlgmr.msra.gmra.mxu0 %v4292_v42 }
 0x140   : > { %3629 = vmatprep.subr.mxu1 %v5490_v4  ;;  %3637 = vmatprep.mubr.msk.f32.mxu1 %vm3946_vm9, %v5490_v4  ;;  %v2138_v40 = vsub.f32 %v4763_v10, %v5487_v28 }
 0x141   : > { %3630 = vmatpush3.msra.mxu1 %v4529_v20  ;;  %2111 = vmatprep.mubr.f32.mxu0 %v5490_v4 }
 0x142   : > { %3631 = vmatprep.subr.mxu1 %v5490_v4  ;;  %2040 = vmatprep.subr.mxu0 %v4756_v57 }
 0x143   : > { %3632 = vmatpush3.msra.mxu1 %v4541_v55  ;;  %v1754_v55 = vsub.s32 1, %v4720_v23  ;;  %2042 = vmatpush1.msra.mxu0 %v4759_v49 }
 0x144   : > { %3633 = vmatprep.subr.mxu1 %v5490_v4 }
 0x145   : > { %3634 = vmatpush3.msra.mxu1 %v4557_v41  ;;  %v1755_v22 = vrot.slane %v1746_v58, %v1754_v55 }
 0x146   : > { %3635 = vmatprep.subr.mxu1 %v5490_v4 }
 0x147   : > { %3636 = vmatpush3.msra.mxu1 %v4569_v56 }
 0x148   : > { %3638 = vmatmul.mubr.f32.vlgmr.msra.gmra.mxu1 %v4292_v42  ;;  %v1750_v42 = vsub.s32 0, %v4720_v23  ;;  %v1858_v23 = vpop.permute.xlu0 %1857 }
 0x149   : > { %2287 = vmatprep.mubr.f32.mxu1 %v5490_v4 }
 0x14a   : > { %v1751_v39 = vrot.slane %v1746_v58, %v1750_v42 }
 0x19d   : > { %v609_v6 = vpop.f32.mrf.mxu0 }
 0x19e   : > { %v610_v11 = vadd.f32 %v609_v6, %v514_v38 }
 0x19f   : > { %v611_v12 = vpop.f32.mrf.mxu0 }
 0x1a0   : > { %v612_v3 = vadd.f32 %v611_v12, %v514_v38  ;;  %v2139_v12 = vand.u32 4294901760, %v2138_v40 }
 0x1a2   : > { %2140 = vmatprep.subr.mxu1 %v2139_v12 }
 0x1a5   : > { %v771_v46 = vpop.f32.mrf.mxu1 }
 0x1a6   : > { %v772_v19 = vadd.f32 %v771_v46, %v610_v11  ;;  %v2145_v11 = vand.u32 4294901760, %v2144_v52 }
 0x1a7   : > { %v773_v51 = vpop.f32.mrf.mxu1 }
 0x1a8   : > { %v774_v60 = vadd.f32 %v773_v51, %v612_v3  ;;  %2146 = vmatpush1.msra.mxu1 %v2145_v11  ;;  %v2017_v51 = vld [vmem:[%s5465_s5] sm:$0xff] }
 0x1af   : > { %v880_v9 = vpop.f32.mrf.mxu0 }
 0x1b0   : > { %v881_v29 = vadd.f32 %v880_v9, %v772_v19 }
 0x1b1   : > { %v882_v1 = vpop.f32.mrf.mxu0 }
 0x1b2   : > { %v883_v0 = vadd.f32 %v882_v1, %v774_v60 }
 0x1b8   : > { %v972_v24 = vpop.f32.mrf.mxu1 }
 0x1b9   : > { %v973_v47 = vadd.f32 %v972_v24, %v881_v29 }
 0x1ba   : > { %v974_v53 = vpop.f32.mrf.mxu1 }
 0x1bb   : > { %v975_v20 = vadd.f32 %v974_v53, %v883_v0  ;;  %v1986_v0 = vld [vmem:[%s5464_s4] sm:$0xff] }
 0x1c3   : > { %v1098_v34 = vpop.f32.mrf.mxu0 }
 0x1c4   : > { %v1099_v59 = vadd.f32 %v1098_v34, %v973_v47 }
 0x1c5   : > { %v1100_v15 = vpop.f32.mrf.mxu0 }
 0x1c6   : > { %v1101_v2 = vadd.f32 %v1100_v15, %v975_v20 }
 0x1cc   : > { %v1188_v33 = vpop.f32.mrf.mxu1 }
 0x1cd   : > { %v1189_v62 = vadd.f32 %v1188_v33, %v1099_v59 }
 0x1ce   : > { %v1190_v43 = vpop.f32.mrf.mxu1 }
 0x1cf   : > { %v1743_v5 = vmax.f32 %v1189_v62, 0.0  ;;  %v1191_v54 = vadd.f32 %v1190_v43, %v1101_v2 }
 0x1d1   : > { %v4726_v26 = vmul.f32 %v1751_v39, %v1743_v5  ;;  %v1744_v8 = vmax.f32 %v1191_v54, 0.0 }
 0x1d3   : > { %1938 = vrot.lane.b32.xlu1 %v4726_v26, %s3937_s7  ;;  %1963 = vrot.lane.b32.xlu0 %v4726_v26, %s3936_s15  ;;  %v4741_v13 = vmul.f32 %v1755_v22, %v1744_v8  ;;  %v4828_v60 = vand.u32 4294901760, %v4726_v26  ;;  %v2025_v8 = vsel %vm2023_vm10, %v1986_v0, 0 }
 0x1d5   : > { %v4824_v59 = vand.u32 4294901760, %v4741_v13 }
 0x1d7   : > { %1888 = vrot.lane.b32.xlu1 %v4726_v26, %s3939_s18  ;;  %1913 = vrot.lane.b32.xlu0 %v4726_v26, %s3938_s16  ;;  %v4833_v39 = vsub.f32 %v4741_v13, %v4824_v59 }
 0x1d8   : > { %v1273_v7 = vpop.f32.mrf.mxu0 }
 0x1d9   : > { %v1274_v61 = vadd.f32 %v1273_v7, %v514_v38  ;;  %v1759_v38 = vrot.slane %v1746_v58, %v1758_v27  ;;  %v4851_v7 = vsub.f32 %v4726_v26, %v4828_v60  ;;  %v5479_v22 = vand.u32 4294901760, %v4833_v39 }
 0x1da   : > { %v3534_v30 = vpop.f32.mrf.mxu0 }
 0x1db   : > { %1834 = vrot.lane.b32.xlu1 %v4726_v26, %s3941_s11  ;;  %1859 = vrot.lane.b32.xlu0 %v4726_v26, %s3940_s19  ;;  %v5492_v44 = vand.u32 4294901760, %v4851_v7 }
 0x1df   : > { %1965 = vrot.lane.b32.xlu1 %v4741_v13, %s3936_s15  ;;  %1915 = vrot.lane.b32.xlu0 %v4741_v13, %s3938_s16 }
 0x1e0   : > { %v1389_v41 = vpop.f32.mrf.mxu1 }
 0x1e1   : > { %v1390_v31 = vadd.f32 %v1389_v41, %v1274_v61 }
 0x1e2   : > { %v3555_v16 = vpop.f32.mrf.mxu1 }
 0x1e3   : > { %1940 = vrot.lane.b32.xlu1 %v4741_v13, %s3937_s7  ;;  %1836 = vrot.lane.b32.xlu0 %v4741_v13, %s3941_s11 }
 0x1e7   : > { %1890 = vrot.lane.b32.xlu1 %v4741_v13, %s3939_s18 }
 0x1eb   : > { %v1479_v45 = vpop.f32.mrf.mxu0  ;;  %1861 = vrot.lane.b32.xlu1 %v4741_v13, %s3940_s19 }
 0x1ec   : > { %v1480_v18 = vadd.f32 %v1479_v45, %v1390_v31 }
 0x1ed   : > { %v3576_v56 = vpop.f32.mrf.mxu0 }
 0x1f4   : > { %v1561_v32 = vpop.f32.mrf.mxu1 }
 0x1f5   : > { %v1562_v25 = vadd.f32 %v1561_v32, %v1480_v18  ;;  %v4889_v18 = vsub.f32 %v4833_v39, %v5479_v22 }
 0x1f6   : > { %v3597_v21 = vpop.f32.mrf.mxu1 }
 0x1ff   : > { %v1659_v35 = vpop.f32.mrf.mxu0 }
 0x200   : > { %v1660_v37 = vadd.f32 %v1659_v35, %v1562_v25 }
 0x201   : > { %v3618_v48 = vpop.f32.mrf.mxu0 }
 0x208   : > { %v1739_v50 = vpop.f32.mrf.mxu1 }
 0x209   : > { %v1740_v6 = vadd.f32 %v1739_v50, %v1660_v37 }
 0x20a   : > { %v3639_v46 = vpop.f32.mrf.mxu1 }
 0x20b   : > { %v1745_v14 = vmax.f32 %v1740_v6, 0.0 }
 0x20d   : > { %v4778_v9 = vmul.f32 %v1759_v38, %v1745_v14 }
 0x20f   : > { %5520 = vst [vmem:[#allocation11_spill] sm:$0xff] %v4778_v9  ;;  %1942 = vrot.lane.b32.xlu0 %v4778_v9, %s3937_s7  ;;  %1967 = vrot.lane.b32.xlu1 %v4778_v9, %s3936_s15 }
 0x213   : > { %1892 = vrot.lane.b32.xlu0 %v4778_v9, %s3939_s18  ;;  %1917 = vrot.lane.b32.xlu1 %v4778_v9, %s3938_s16 }
 0x217   : > { %1809 = vrot.lane.b32.xlu0 %v4726_v26, %s3942_s13  ;;  %1832 = vrot.lane.b32.xlu1 %v5490_v4, %s3941_s11 }
 0x21b   : > { %1807 = vrot.lane.b32.xlu0 %v5490_v4, %s3942_s13  ;;  %1811 = vrot.lane.b32.xlu1 %v4741_v13, %s3942_s13 }
 0x21f   : > { %1786 = vrot.lane.b32.xlu0 %v4741_v13, %s3944_s12  ;;  %1784 = vrot.lane.b32.xlu1 %v4726_v26, %s3944_s12  ;;  %v4869_v26 = vand.u32 4294901760, %v2025_v8 }
 0x221   : > { %v4915_v46 = vsub.f32 %v2025_v8, %v4869_v26 }
 0x223   : > { %1969 = vrot.lane.b32.xlu0 %v5490_v4, %s3936_s15  ;;  %1782 = vrot.lane.b32.xlu1 %v5490_v4, %s3944_s12  ;;  %s3873_s15 = sshll.u32 %s3947_s10, 4  ;;  %s3874_s15 = int_to_ptr.vmem [resolvable:$false] %s3873_s15 }
 0x227   : > { %1919 = vrot.lane.b32.xlu0 %v5490_v4, %s3938_s16  ;;  %1944 = vrot.lane.b32.xlu1 %v5490_v4, %s3937_s7 }
 0x22b   : > { %1863 = vrot.lane.b32.xlu0 %v4778_v9, %s3940_s19  ;;  %1894 = vrot.lane.b32.xlu1 %v5490_v4, %s3939_s18  ;;  %s3782_s19 = smul.u32 384, %s4004_s25  ;;  %s3875_s25 = scalar_lea.vmem %s3874_s15, 768 }
 0x22d   : > { %s3308_s17 = scalar_lea.hbm %s5466_s6, %s3782_s19 }
 0x22f   : > { %1813 = vrot.lane.b32.xlu0 %v4778_v9, %s3942_s13  ;;  %1838 = vrot.lane.b32.xlu1 %v4778_v9, %s3941_s11 }
 0x233   : > { %2020 = vperm.xlu0 %3840, %v2017_v51   ;;  %1788 = vrot.lane.b32.xlu1 %v4778_v9, %s3944_s12 }
 0x245   : > { %v1939_v19 = vpop.permute.xlu1 %1938  ;;  %v1964_v24 = vpop.permute.xlu0 %1963 }
 0x249   : > { %v1889_v1 = vpop.permute.xlu1 %1888  ;;  %v1914_v34 = vpop.permute.xlu0 %1913 }
 0x24d   : > { %v4821_v29 = vpop.permute.xlu1 %1834  ;;  %v1860_v47 = vpop.permute.xlu0 %1859 }
 0x24e   : > { %v1865_v54 = vsel %vm362_vm4, %v1858_v23, %v1860_v47 }
 0x24f   : > { %v4861_v16 = vand.u32 4294901760, %v1865_v54 }
 0x251   : > { %v1966_v3 = vpop.permute.xlu1 %1965  ;;  %v1916_v53 = vpop.permute.xlu0 %1915  ;;  %v4901_v50 = vsub.f32 %v1865_v54, %v4861_v16 }
 0x252   : > { %v1971_v33 = vsel %vm472_vm0, %v1964_v24, %v1966_v3  ;;  %v1921_v15 = vsel %vm420_vm2, %v1914_v34, %v1916_v53 }
 0x253   : > { %v4838_v5 = vand.u32 4294901760, %v1971_v33  ;;  %v4854_v30 = vand.u32 4294901760, %v1921_v15  ;;  %v5493_v54 = vand.u32 4294901760, %v4901_v50 }
 0x255   : > { %v1941_v42 = vpop.permute.xlu1 %1940  ;;  %v4841_v20 = vpop.permute.xlu0 %1836  ;;  %v4857_v13 = vsub.f32 %v1971_v33, %v4838_v5  ;;  %v4892_v25 = vsub.f32 %v1921_v15, %v4854_v30 }
 0x256   : > { %v1946_v62 = vsel %vm446_vm1, %v1939_v19, %v1941_v42  ;;  %5521 = vst [vmem:[#allocation12_spill] sm:$0xff] %v4841_v20  ;;  %v1841_v31 = vsel %vm336_vm6, %v4821_v29, %v4841_v20 }
 0x257   : > { %v4847_v55 = vand.u32 4294901760, %v1946_v62  ;;  %v5482_v27 = vand.u32 4294901760, %v4857_v13  ;;  %v4917_v11 = vand.u32 4294901760, %v1841_v31 }
 0x259   : > { %v1891_v58 = vpop.permute.xlu1 %1890  ;;  %v4872_v21 = vsub.f32 %v1946_v62, %v4847_v55 }
 0x25a   : > { %v1896_v43 = vsel %vm394_vm3, %v1889_v1, %v1891_v58 }
 0x25b   : > { %v4859_v41 = vand.u32 4294901760, %v1896_v43  ;;  %v5480_v14 = vand.u32 4294901760, %v4872_v21 }
 0x25d   : > { %v4844_v2 = vpop.permute.xlu1 %1861  ;;  %v4896_v37 = vsub.f32 %v1896_v43, %v4859_v41  ;;  %v2168_v8 = vsub.f32 %v4872_v21, %v5480_v14 }
 0x25e   : > { %5522 = vst [vmem:[#allocation13_spill] sm:$0xff] %v4844_v2  ;;  %v1866_v45 = vsel %vm362_vm4, %v1860_v47, %v4844_v2  ;;  %v2156_v47 = vsub.f32 %v4857_v13, %v5482_v27 }
 0x25f   : > { %v4898_v40 = vand.u32 4294901760, %v1866_v45 }
 0x281   : > { %v4865_v56 = vpop.permute.xlu0 %1942  ;;  %v4867_v32 = vpop.permute.xlu1 %1967 }
 0x282   : > { %v1947_v61 = vsel %vm446_vm1, %v1941_v42, %v4865_v56  ;;  %v1972_v35 = vsel %vm472_vm0, %v1966_v3, %v4867_v32  ;;  %v5484_v3 = vand.u32 4294901760, %v4892_v25  ;;  %v5485_v42 = vand.u32 4294901760, %v4896_v37 }
 0x283   : > { %v4882_v63 = vand.u32 4294901760, %v1947_v61  ;;  %v4884_v48 = vand.u32 4294901760, %v1972_v35 }
 0x284   : > { %v2180_v14 = vsub.f32 %v4892_v25, %v5484_v3 }
 0x285   : > { %v4904_v52 = vsub.f32 %v1947_v61, %v4882_v63  ;;  %v4907_v6 = vsub.f32 %v1972_v35, %v4884_v48  ;;  %v4909_v38 = vpop.permute.xlu0 %1892  ;;  %2044 = vmatprep.subr.mxu0 %v4884_v48  ;;  %v4912_v12 = vpop.permute.xlu1 %1917  ;;  %v4962_v61 = vand.u32 4294901760, %v4915_v46  ;;  %v4965_v35 = vsub.f32 %v1841_v31, %v4917_v11 }
 0x286   : > { %v1897_v51 = vsel %vm394_vm3, %v1891_v58, %v4909_v38  ;;  %v1922_v19 = vsel %vm420_vm2, %v1916_v53, %v4912_v12  ;;  %2046 = vmatpush1.msra.mxu0 %v4838_v5  ;;  %v4938_v53 = vsub.f32 %v1866_v45, %v4898_v40 }
 0x287   : > { %v4925_v23 = vand.u32 4294901760, %v1897_v51  ;;  %v4927_v1 = vand.u32 4294901760, %v1922_v19  ;;  %2048 = vmatprep.subr.mxu0 %v4882_v63  ;;  %v5483_v24 = vand.u32 4294901760, %v4907_v6  ;;  %v5481_v34 = vand.u32 4294901760, %v4904_v52 }
 0x288   : > { %2050 = vmatpush1.msra.mxu0 %v4847_v55 }
 0x289   : > { %v4942_v58 = vsub.f32 %v1897_v51, %v4925_v23  ;;  %v4945_v33 = vsub.f32 %v1922_v19, %v4927_v1  ;;  %v1810_v62 = vpop.permute.xlu0 %1809  ;;  %2052 = vmatprep.subr.mxu0 %v4927_v1  ;;  %v1833_v0 = vpop.permute.xlu1 %1832  ;;  %v2150_v15 = vsub.f32 %v4907_v6, %v5483_v24  ;;  %v2162_v43 = vsub.f32 %v4904_v52, %v5481_v34 }
 0x28a   : > { %v1840_v45 = vsel %vm336_vm6, %v1833_v0, %v4821_v29  ;;  %2054 = vmatpush1.msra.mxu0 %v4854_v30  ;;  %v2192_v29 = vsub.f32 %v4896_v37, %v5485_v42  ;;  %v2157_v0 = vand.u32 4294901760, %v2156_v47  ;;  %v5494_v42 = vand.u32 4294901760, %v4938_v53 }
 0x28b   : > { %v4967_v51 = vand.u32 4294901760, %v1840_v45  ;;  %2056 = vmatprep.subr.mxu0 %v4925_v23  ;;  %v2151_v19 = vand.u32 4294901760, %v2150_v15  ;;  %v5488_v22 = vand.u32 4294901760, %v4945_v33  ;;  %v5489_v31 = vand.u32 4294901760, %v4942_v58 }
 0x28c   : > { %2058 = vmatpush1.msra.mxu0 %v4859_v41  ;;  %v2163_v24 = vand.u32 4294901760, %v2162_v43 }
 0x28d   : > { %v4980_v34 = vsub.f32 %v1840_v45, %v4967_v51  ;;  %v1808_v27 = vpop.permute.xlu0 %1807  ;;  %2060 = vmatprep.subr.mxu0 %v4824_v59  ;;  %2152 = vmatprep.subr.mxu1 %v2151_v19  ;;  %v4983_v15 = vpop.permute.xlu1 %1811  ;;  %v2174_v3 = vsub.f32 %v4945_v33, %v5488_v22  ;;  %v2169_v45 = vand.u32 4294901760, %v2168_v8  ;;  %v2186_v19 = vsub.f32 %v4942_v58, %v5489_v31 }
 0x28e   : > { %5523 = vst [vmem:[#allocation14_spill] sm:$0xff] %v4983_v15  ;;  %v1815_v47 = vsel %vm310_vm7, %v1808_v27, %v1810_v62  ;;  %v1816_v36 = vsel %vm310_vm7, %v1810_v62, %v4983_v15  ;;  %2062 = vmatpush1.msra.mxu0 %v4828_v60  ;;  %2158 = vmatpush1.msra.mxu1 %v2157_v0  ;;  %v5497_v27 = vand.u32 4294901760, %v4965_v35  ;;  %v2181_v8 = vand.u32 4294901760, %v2180_v14 }
 0x28f   : > { %v4996_v43 = vand.u32 4294901760, %v1815_v47  ;;  %v4998_v28 = vand.u32 4294901760, %v1816_v36  ;;  %2064 = vmatprep.subr.mxu0 %v4898_v40  ;;  %2164 = vmatprep.subr.mxu1 %v2163_v24  ;;  %v2175_v22 = vand.u32 4294901760, %v2174_v3  ;;  %v2199_v0 = vand.u32 4294901760, %v4889_v18 }
 0x290   : > { %2066 = vmatpush1.msra.mxu0 %v4861_v16  ;;  %2170 = vmatpush1.msra.mxu1 %v2169_v45  ;;  %v2204_v31 = vsub.f32 %v4851_v7, %v5492_v44  ;;  %v2187_v45 = vand.u32 4294901760, %v2186_v19  ;;  %v2210_v18 = vsub.f32 %v4938_v53, %v5494_v42  ;;  %v2216_v14 = vsub.f32 %v4901_v50, %v5493_v54 }
 0x291   : > { %v5009_v4 = vsub.f32 %v1815_v47, %v4996_v43  ;;  %v5012_v24 = vsub.f32 %v1816_v36, %v4998_v28  ;;  %v5014_v3 = vpop.permute.xlu0 %1786  ;;  %2068 = vmatprep.subr.mxu0 %v4917_v11  ;;  %2176 = vmatprep.subr.mxu1 %v2175_v22  ;;  %v1785_v62 = vpop.permute.xlu1 %1784  ;;  %v2193_v36 = vand.u32 4294901760, %v2192_v29  ;;  %v2115_v22 = vsub.f32 %v4915_v46, %v4962_v61 }
 0x292   : > { %5524 = vst [vmem:[#allocation15_spill] sm:$0xff] %v5014_v3  ;;  %v1791_v47 = vsel %vm284_vm8, %v1785_v62, %v5014_v3  ;;  %2070 = vmatpush1.msra.mxu0 %v4967_v51  ;;  %2182 = vmatpush1.msra.mxu1 %v2181_v8  ;;  %v2222_v54 = vsub.f32 %v4965_v35, %v5497_v27  ;;  %v5525_v3 = vand.u32 4294901760, %v4980_v34  ;;  %v2205_v8 = vand.u32 4294901760, %v2204_v31 }
 0x293   : > { %v5029_v44 = vand.u32 4294901760, %v1791_v47  ;;  %2072 = vmatprep.subr.mxu0 %v4998_v28  ;;  %2188 = vmatprep.subr.mxu1 %v2187_v45  ;;  %v5502_v42 = vand.u32 4294901760, %v5012_v24  ;;  %v2211_v15 = vand.u32 4294901760, %v2210_v18  ;;  %v5526_v20 = vand.u32 4294901760, %v5009_v4 }
 0x294   : > { %v2228_v29 = vsub.f32 %v4980_v34, %v5525_v3  ;;  %2074 = vmatpush1.msra.mxu0 %v4996_v43  ;;  %2194 = vmatpush1.msra.mxu1 %v2193_v36  ;;  %v2217_v31 = vand.u32 4294901760, %v2216_v14  ;;  %v5051_v36 = vand.u32 4294901760, %v2115_v22  ;;  %v5527_v14 = vmov 0.0  }
 0x295   : > { %v5041_v19 = vsub.f32 %v1791_v47, %v5029_v44  ;;  %2076 = vmatprep.subr.mxu0 %v5029_v44  ;;  %2200 = vmatprep.subr.mxu1 %v2199_v0  ;;  %v1783_v45 = vpop.permute.xlu1 %1782  ;;  %v2234_v27 = vsub.f32 %v5012_v24, %v5502_v42  ;;  %v2240_v3 = vsub.f32 %v5009_v4, %v5526_v20  ;;  %v2223_v0 = vand.u32 4294901760, %v2222_v54 }
 0x296   : > { %v1790_v9 = vsel %vm284_vm8, %v1783_v45, %v1785_v62  ;;  %2206 = vmatpush1.msra.mxu1 %v2205_v8  ;;  %v2229_v18 = vand.u32 4294901760, %v2228_v29  ;;  %v5528_v29 = vand.u32 4294901760, %v4763_v10  ;;  %v5529_v8 = vand.u32 4294901760, %v4767_v17 }
 0x297   : > { %v5053_v47 = vand.u32 4294901760, %v1790_v9  ;;  %2212 = vmatprep.subr.mxu1 %v2211_v15  ;;  %v2245_v2 = vand.u32 4294901760, %v5041_v19  ;;  %v2235_v20 = vand.u32 4294901760, %v2234_v27  ;;  %v2241_v62 = vand.u32 4294901760, %v2240_v3 }
 0x298   : > { %2218 = vmatpush1.msra.mxu1 %v2217_v31  ;;  %v5530_v45 = vand.u32 4294901760, %v4907_v6  ;;  %v5531_v3 = vand.u32 4294901760, %v4857_v13  ;;  %v5534_v31 = vand.u32 4294901760, %v4945_v33 }
 0x299   : > { %v5057_v42 = vsub.f32 %v1790_v9, %v5053_v47  ;;  %2078 = vmatpush1.msra.mxu0 %v5053_v47  ;;  %2224 = vmatprep.subr.mxu1 %v2223_v0  ;;  %v2246_v15 = vsub.f32 %v5041_v19, %v2245_v2  ;;  %v5536_v0 = vand.u32 4294901760, %v4942_v58 }
 0x29a   : > { %2117 = vmatmul.mubr.f32.vlgmr.msra.gmra.mxu0 %v5051_v36  ;;  %2230 = vmatpush1.msra.mxu1 %v2229_v18  ;;  %v5538_v18 = vand.u32 4294901760, %v4833_v39 }
 0x29b   : > { %v2251_v54 = vand.u32 4294901760, %v5057_v42  ;;  %2309 = vmatprep.subr.mxu0 %v4763_v10  ;;  %2236 = vmatprep.subr.mxu1 %v2235_v20  ;;  %v2247_v9 = vand.u32 4294901760, %v2246_v15  ;;  %v5532_v10 = vand.u32 4294901760, %v4904_v52 }
 0x29c   : > { %2312 = vmatpush1.msra.mxu0 %v4767_v17  ;;  %2242 = vmatpush1.msra.mxu1 %v2241_v62  ;;  %v5533_v17 = vand.u32 4294901760, %v4872_v21 }
 0x29d   : > { %v2252_v27 = vsub.f32 %v5057_v42, %v2251_v54  ;;  %2315 = vmatprep.subr.mxu0 %v4907_v6  ;;  %2248 = vmatprep.subr.mxu1 %v2247_v9  ;;  %v1970_v6 = vpop.permute.xlu0 %1969 }
 0x29e   : > { %2318 = vmatpush1.msra.mxu0 %v4857_v13  ;;  %2399 = vmatprep.mubr.f32.mxu0 %v5527_v14  ;;  %v5535_v13 = vand.u32 4294901760, %v4892_v25 }
 0x29f   : > { %2321 = vmatprep.subr.mxu0 %v4904_v52  ;;  %v2253_v22 = vand.u32 4294901760, %v2252_v27  ;;  %v1945_v52 = vpop.permute.xlu1 %1944 }
 0x2a0   : > { %2324 = vmatpush1.msra.mxu0 %v4872_v21  ;;  %v5537_v21 = vand.u32 4294901760, %v4896_v37 }
 0x2a1   : > { %2327 = vmatprep.subr.mxu0 %v4945_v33  ;;  %2254 = vmatpush1.msra.mxu1 %v2253_v22  ;;  %v1982_v33 = vld [vmem:[%s4073_s29 + $0x18] sm:$0xff]  ;;  %v1920_v20 = vpop.permute.xlu0 %1919  ;;  %s3781_s29 = smul.u32 24, %s4069_s20 }
 0x2a2   : > { %2330 = vmatpush1.msra.mxu0 %v4892_v25  ;;  %2289 = vmatmul.mubr.f32.vlgmr.msra.gmra.mxu1 %v4869_v26  ;;  %v5539_v25 = vand.u32 4294901760, %v4851_v7 }
 0x2a3   : > { %2333 = vmatprep.subr.mxu0 %v4942_v58  ;;  %2421 = vmatprep.subr.mxu1 %v4756_v57  ;;  %v5540_v58 = vand.u32 4294901760, %v4938_v53  ;;  %s267_s18 = scalar_lea.vmem [#allocation8], %s3781_s29 }
 0x2a4   : > { %2336 = vmatpush1.msra.mxu0 %v4896_v37  ;;  %2423 = vmatpush1.msra.mxu1 %v4759_v49  ;;  %v1973_v37 = vsel %vm472_vm0, %v4867_v32, %v1970_v6  ;;  %s3310_s11 = sshll.u32 %s267_s18, 4  ;;  %s3311_s11 = int_to_ptr.vmem [resolvable:$true] %s3310_s11 }
 0x2a5   : > { %2339 = vmatprep.subr.mxu0 %v4833_v39  ;;  %2425 = vmatprep.subr.mxu1 %v4884_v48  ;;  %v1895_v39 = vpop.permute.xlu1 %1894  ;;  %v5159_v32 = vand.u32 4294901760, %v1973_v37  ;;  %s3869_s28 = scalar_lea.vmem %s3311_s11, 384  ;;  %p3876_p1 = scmp.lt.s32.totalorder %s3311_s11, %s3874_s15 }
 0x2a6   : > { %2342 = vmatpush1.msra.mxu0 %v4851_v7  ;;  %2427 = vmatpush1.msra.mxu1 %v4838_v5  ;;  %v5542_v7 = vand.u32 4294901760, %v4965_v35  ;;  %p3870_p11 = scmp.ne.s32.totalorder %s3311_s11, %s3869_s28  ;;  %p3877_p3 = scmp.lt.s32.totalorder %s3875_s25, %s3869_s28 }
 0x2a7   : > { %2345 = vmatprep.subr.mxu0 %v4938_v53  ;;  %2429 = vmatprep.subr.mxu1 %v4882_v63 }
 0x2a8   : > { %2348 = vmatpush1.msra.mxu0 %v4901_v50  ;;  %2431 = vmatpush1.msra.mxu1 %v4847_v55  ;;  %p3871_p13 = pnand %p3870_p11, %p5551_p12  ;;  %p3878_p8 = por %p3877_p3, %p3876_p1 }
 0x2a9   : > { %2351 = vmatprep.subr.mxu0 %v4965_v35  ;;  %2433 = vmatprep.subr.mxu1 %v4927_v1 }
 0x2aa   : > { %2354 = vmatpush1.msra.mxu0 %v4980_v34  ;;  %2435 = vmatpush1.msra.mxu1 %v4854_v30  ;;  %p3872_p0 = pneg %p3871_p13 }
 0x2ab   : > { %2357 = vmatprep.subr.mxu0 %v5012_v24  ;;  %2437 = vmatprep.subr.mxu1 %v4925_v23 }
 0x2ac   : > { %2360 = vmatpush1.msra.mxu0 %v5009_v4  ;;  %2439 = vmatpush1.msra.mxu1 %v4859_v41  ;;  %p3879_p10 = pnand %p3878_p8, %p3872_p0 }
 0x2ad   : > { %2363 = vmatprep.subr.mxu0 %v5041_v19  ;;  %2441 = vmatprep.subr.mxu1 %v4824_v59  ;;  %v5548_v19 = vld [vmem:[#allocation12_spill] sm:$0xff] }
 0x2ae   : > { %2366 = vmatpush1.msra.mxu0 %v5057_v42  ;;  %2443 = vmatpush1.msra.mxu1 %v4828_v60 }
 0x2af   : > { %2402 = vmatmul.mubr.f32.vlgmr.msra.gmra.mxu0 %v4915_v46  ;;  %2445 = vmatprep.subr.mxu1 %v4898_v40 }
 0x2b0   : > { %2517 = vmatprep.subr.mxu0 %v5528_v29  ;;  %2447 = vmatpush1.msra.mxu1 %v4861_v16 }
 0x2b1   : > { %2521 = vmatpush1.msra.mxu0 %v5529_v8  ;;  %2449 = vmatprep.subr.mxu1 %v4917_v11 }
 0x2b2   : > { %2525 = vmatprep.subr.mxu0 %v5530_v45  ;;  %2451 = vmatpush1.msra.mxu1 %v4967_v51  ;;  %v5550_v45 = vld [vmem:[#allocation15_spill] sm:$0xff] }
 0x2b3   : > { %2529 = vmatpush1.msra.mxu0 %v5531_v3  ;;  %2453 = vmatprep.subr.mxu1 %v4998_v28 }
 0x2b4   : > { %2533 = vmatprep.subr.mxu0 %v5532_v10  ;;  %2455 = vmatpush1.msra.mxu1 %v4996_v43 }
 0x2b5   : > { %2537 = vmatpush1.msra.mxu0 %v5533_v17  ;;  %2457 = vmatprep.subr.mxu1 %v5029_v44 }
 0x2b6   : > { %2541 = vmatprep.subr.mxu0 %v5534_v31  ;;  %2459 = vmatpush1.msra.mxu1 %v5053_v47 }
 0x2b7   : > { %2492 = vmatprep.mubr.f32.mxu1 %v5527_v14  ;;  %2545 = vmatpush1.msra.mxu0 %v5535_v13 }
 0x2b8   : > { %2496 = vmatmul.mubr.f32.vlgmr.msra.gmra.mxu1 %v4962_v61  ;;  %2549 = vmatprep.subr.mxu0 %v5536_v0 }
 0x2b9   : > { %2647 = vmatprep.subr.mxu1 %v4756_v57  ;;  %2553 = vmatpush1.msra.mxu0 %v5537_v21  ;;  %v5144_v57 = vand.u32 4294901760, %v1982_v33 }
 0x2ba   : > { %2649 = vmatpush1.msra.mxu1 %v4759_v49  ;;  %2557 = vmatprep.subr.mxu0 %v5538_v18  ;;  %v5541_v49 = vand.u32 4294901760, %v4901_v50  ;;  %v1923_v50 = vsel %vm420_vm2, %v4912_v12, %v1920_v20  ;;  %v5183_v12 = vsub.f32 %v1973_v37, %v5159_v32 }
 0x2bb   : > { %2651 = vmatprep.subr.mxu1 %v4884_v48  ;;  %2561 = vmatpush1.msra.mxu0 %v5539_v25  ;;  %v5543_v48 = vand.u32 4294901760, %v4980_v34  ;;  %v1864_v34 = vpop.permute.xlu0 %1863 }
 0x2bc   : > { %2653 = vmatpush1.msra.mxu1 %v4838_v5  ;;  %2565 = vmatprep.subr.mxu0 %v5540_v58  ;;  %v1948_v5 = vsel %vm446_vm1, %v4865_v56, %v1945_v52  ;;  %v5545_v56 = vand.u32 4294901760, %v5009_v4  ;;  %v5185_v4 = vand.u32 4294901760, %v1923_v50 }
 0x2bd   : > { %2655 = vmatprep.subr.mxu1 %v4882_v63  ;;  %2569 = vmatpush1.msra.mxu0 %v5541_v49  ;;  %v5544_v63 = vand.u32 4294901760, %v5012_v24 }
 0x2be   : > { %2657 = vmatpush1.msra.mxu1 %v4847_v55  ;;  %2573 = vmatprep.subr.mxu0 %v5542_v7  ;;  %v5165_v55 = vsub.f32 %v1982_v33, %v5144_v57  ;;  %v5208_v35 = vsub.f32 %v1923_v50, %v5185_v4 }
 0x2bf   : > { %2659 = vmatprep.subr.mxu1 %v4927_v1  ;;  %2577 = vmatpush1.msra.mxu0 %v5543_v48  ;;  %v5172_v1 = vand.u32 4294901760, %v1948_v5  ;;  %v1814_v24 = vpop.permute.xlu0 %1813 }
 0x2c0   : > { %2661 = vmatpush1.msra.mxu1 %v4854_v30  ;;  %2581 = vmatprep.subr.mxu0 %v5544_v63  ;;  %v1898_v30 = vsel %vm394_vm3, %v4909_v38, %v1895_v39  ;;  %v5546_v38 = vld [vmem:[#allocation13_spill] sm:$0xff]  ;;  %v2847_v29 = vand.u32 4294901760, %v5208_v35 }
 0x2c1   : > { %2663 = vmatprep.subr.mxu1 %v4925_v23  ;;  %2585 = vmatpush1.msra.mxu0 %v5545_v56  ;;  %v1839_v23 = vpop.permute.xlu1 %1838  ;;  %v1867_v42 = vsel %vm362_vm4, %v5546_v38, %v1864_v34 }
 0x2c2   : > { %2665 = vmatpush1.msra.mxu1 %v4859_v41  ;;  %2589 = vmatprep.subr.mxu0 %v2245_v2  ;;  %v2826_v2 = vand.u32 4294901760, %v5165_v55  ;;  %v5195_v41 = vand.u32 4294901760, %v1898_v30  ;;  %v5220_v15 = vand.u32 4294901760, %v1867_v42  ;;  %v2848_v31 = vsub.f32 %v5208_v35, %v2847_v29 }
 0x2c3   : > { %2667 = vmatprep.subr.mxu1 %v4824_v59  ;;  %2593 = vmatpush1.msra.mxu0 %v2251_v54  ;;  %v5193_v59 = vsub.f32 %v1948_v5, %v5172_v1 }
 0x2c4   : > { %2626 = vmatprep.mubr.f32.mxu0 %v5527_v14  ;;  %2669 = vmatpush1.msra.mxu1 %v4828_v60  ;;  %v5547_v60 = vld [vmem:[#allocation11_spill] sm:$0xff]  ;;  %v5223_v54 = vsub.f32 %v1898_v30, %v5195_v41  ;;  %v5251_v10 = vsub.f32 %v1867_v42, %v5220_v15  ;;  %v2849_v37 = vand.u32 4294901760, %v2848_v31 }
 0x2c5   : > { %2628 = vmatmul.mubr.f32.vlgmr.msra.gmra.mxu0 %v4869_v26  ;;  %2671 = vmatprep.subr.mxu1 %v4898_v40  ;;  %v5204_v53 = vand.u32 4294901760, %v5547_v60  ;;  %v2833_v40 = vand.u32 4294901760, %v5183_v12  ;;  %v2840_v62 = vand.u32 4294901760, %v5193_v59  ;;  %v1789_v9 = vpop.permute.xlu1 %1788 }
 0x2c6   : > { %3640 = vmatprep.subr.mxu0 %v5527_v14  ;;  %2673 = vmatpush1.msra.mxu1 %v4861_v16  ;;  %v2827_v16 = vsub.f32 %v5165_v55, %v2826_v2  ;;  %v2854_v17 = vand.u32 4294901760, %v5223_v54  ;;  %v2868_v21 = vand.u32 4294901760, %v5251_v10 }
 0x2c7   : > { %3641 = vmatpush3.msra.mxu0 %v5144_v57  ;;  %2675 = vmatprep.subr.mxu1 %v4917_v11  ;;  %v1842_v11 = vsel %vm336_vm6, %v5548_v19, %v1839_v23  ;;  %v2834_v22 = vsub.f32 %v5183_v12, %v2833_v40  ;;  %v2841_v3 = vsub.f32 %v5193_v59, %v2840_v62 }
 0x2c8   : > { %3642 = vmatprep.subr.mxu0 %v5527_v14  ;;  %2677 = vmatpush1.msra.mxu1 %v4967_v51  ;;  %v5549_v51 = vld [vmem:[#allocation14_spill] sm:$0xff]  ;;  %v5239_v8 = vand.u32 4294901760, %v1842_v11  ;;  %v2855_v33 = vsub.f32 %v5223_v54, %v2854_v17  ;;  %v2869_v39 = vsub.f32 %v5251_v10, %v2868_v21 }
 0x2c9   : > { %3643 = vmatpush3.msra.mxu0 %v5159_v32  ;;  %2679 = vmatprep.subr.mxu1 %v4998_v28  ;;  %v1817_v27 = vsel %vm310_vm7, %v5549_v51, %v1814_v24  ;;  %v5233_v28 = vsub.f32 %v5547_v60, %v5204_v53  ;;  %v2835_v0 = vand.u32 4294901760, %v2834_v22  ;;  %v2842_v25 = vand.u32 4294901760, %v2841_v3 }
 0x2ca   : > { %3644 = vmatprep.subr.mxu0 %v5527_v14  ;;  %2681 = vmatpush1.msra.mxu1 %v4996_v43  ;;  %v2828_v43 = vand.u32 4294901760, %v2827_v16  ;;  %v5254_v6 = vand.u32 4294901760, %v1817_v27  ;;  %v5265_v13 = vsub.f32 %v1842_v11, %v5239_v8  ;;  %v2856_v5 = vand.u32 4294901760, %v2855_v33 }
 0x2cb   : > { %3645 = vmatpush3.msra.mxu0 %v5172_v1  ;;  %2683 = vmatprep.subr.mxu1 %v5029_v44  ;;  %v1792_v44 = vsel %vm284_vm8, %v5550_v45, %v1789_v9  ;;  %v2870_v34 = vand.u32 4294901760, %v2869_v39 }
 0x2cc   : > { %3646 = vmatprep.subr.mxu0 %v5527_v14  ;;  %2685 = vmatpush1.msra.mxu1 %v5053_v47  ;;  %v2861_v47 = vand.u32 4294901760, %v5233_v28  ;;  %v5267_v52 = vand.u32 4294901760, %v1792_v44  ;;  %v5277_v18 = vsub.f32 %v1817_v27, %v5254_v6  ;;  %v2875_v20 = vand.u32 4294901760, %v5265_v13 }
 0x2cd   : > { %2718 = vmatprep.mubr.f32.mxu1 %v5527_v14  ;;  %3647 = vmatpush3.msra.mxu0 %v5185_v4 }
 0x2ce   : > { %2720 = vmatmul.mubr.f32.vlgmr.msra.gmra.mxu1 %v4869_v26  ;;  %3648 = vmatprep.subr.mxu0 %v5527_v14  ;;  %v5284_v58 = vsub.f32 %v1792_v44, %v5267_v52  ;;  %v2862_v49 = vsub.f32 %v5233_v28, %v2861_v47  ;;  %v2882_v7 = vand.u32 4294901760, %v5277_v18  ;;  %v2876_v48 = vsub.f32 %v5265_v13, %v2875_v20 }
 0x2cf   : > { %3663 = vmatprep.subr.mxu1 %v5527_v14  ;;  %3649 = vmatpush3.msra.mxu0 %v5195_v41 }
 0x2d0   : > { %3664 = vmatpush3.msra.mxu1 %v2828_v43  ;;  %3650 = vmatprep.subr.mxu0 %v5527_v14  ;;  %v2889_v63 = vand.u32 4294901760, %v5284_v58  ;;  %v2863_v50 = vand.u32 4294901760, %v2862_v49  ;;  %v2883_v56 = vsub.f32 %v5277_v18, %v2882_v7  ;;  %v2877_v23 = vand.u32 4294901760, %v2876_v48 }
 0x2d1   : > { %3665 = vmatprep.subr.mxu1 %v5527_v14  ;;  %3651 = vmatpush3.msra.mxu0 %v5204_v53 }
 0x2d2   : > { %3666 = vmatpush3.msra.mxu1 %v2835_v0  ;;  %3652 = vmatprep.subr.mxu0 %v5527_v14  ;;  %v2890_v30 = vsub.f32 %v5284_v58, %v2889_v63  ;;  %v2884_v38 = vand.u32 4294901760, %v2883_v56 }
 0x2d3   : > { %3667 = vmatprep.subr.mxu1 %v5527_v14  ;;  %3653 = vmatpush3.msra.mxu0 %v5220_v15 }
 0x2d4   : > { %3668 = vmatpush3.msra.mxu1 %v2842_v25  ;;  %3654 = vmatprep.subr.mxu0 %v5527_v14 }
 0x2d5   : > { %3669 = vmatprep.subr.mxu1 %v5527_v14  ;;  %3655 = vmatpush3.msra.mxu0 %v5239_v8 }
 0x2d6   : > { %3670 = vmatpush3.msra.mxu1 %v2849_v37  ;;  %3656 = vmatprep.subr.mxu0 %v5527_v14 }
 0x2d7   : > { %3671 = vmatprep.subr.mxu1 %v5527_v14  ;;  %3657 = vmatpush3.msra.mxu0 %v5254_v6 }
 0x2d8   : > { %3672 = vmatpush3.msra.mxu1 %v2856_v5  ;;  %3658 = vmatprep.subr.mxu0 %v5527_v14 }
 0x2d9   : > { %3673 = vmatprep.subr.mxu1 %v5527_v14  ;;  %3659 = vmatpush3.msra.mxu0 %v5267_v52 }
 0x2da   : > { %3660 = vmatprep.mubr.msk.f32.mxu0 %vm3946_vm9, %v5527_v14  ;;  %3674 = vmatpush3.msra.mxu1 %v2863_v50 }
 0x2db   : > { %3661 = vmatmul.mubr.f32.vlgmr.msra.gmra.mxu0 %v5051_v36  ;;  %3675 = vmatprep.subr.mxu1 %v5527_v14  ;;  %v2891_v36 = vand.u32 4294901760, %v2890_v30 }
 0x2dc   : > { %3686 = vmatprep.subr.mxu0 %v5527_v14  ;;  %3676 = vmatpush3.msra.mxu1 %v2870_v34 }
 0x2dd   : > { %3687 = vmatpush3.msra.mxu0 %v5165_v55  ;;  %3677 = vmatprep.subr.mxu1 %v5527_v14  ;;  %v2021_v55 = vpop.permute.xlu0 %2020 }
 0x2de   : > { %3688 = vmatprep.subr.mxu0 %v5527_v14  ;;  %3678 = vmatpush3.msra.mxu1 %v2877_v23 }
 0x2df   : > { %3689 = vmatpush3.msra.mxu0 %v5183_v12  ;;  %3679 = vmatprep.subr.mxu1 %v5527_v14 }
 0x2e0   : > { %3690 = vmatprep.subr.mxu0 %v5527_v14  ;;  %3680 = vmatpush3.msra.mxu1 %v2884_v38 }
 0x2e1   : > { %3691 = vmatpush3.msra.mxu0 %v5193_v59  ;;  %3681 = vmatprep.subr.mxu1 %v5527_v14 }
 0x2e2   : > { %3692 = vmatprep.subr.mxu0 %v5527_v14  ;;  %3682 = vmatpush3.msra.mxu1 %v2891_v36 }
 0x2e3   : > { %3683 = vmatprep.mubr.msk.f32.mxu1 %vm3946_vm9, %v5527_v14  ;;  %3693 = vmatpush3.msra.mxu0 %v5208_v35 }
 0x2e4   : > { %3684 = vmatmul.mubr.f32.vlgmr.msra.gmra.mxu1 %v4869_v26  ;;  %3694 = vmatprep.subr.mxu0 %v5527_v14 }
 0x2e5   : > { %3709 = vmatprep.subr.mxu1 %v5527_v14  ;;  %3695 = vmatpush3.msra.mxu0 %v5223_v54 }
 0x2e6   : > { %3710 = vmatpush3.msra.mxu1 %v5144_v57  ;;  %3696 = vmatprep.subr.mxu0 %v5527_v14 }
 0x2e7   : > { %3711 = vmatprep.subr.mxu1 %v5527_v14  ;;  %3697 = vmatpush3.msra.mxu0 %v5233_v28 }
 0x2e8   : > { %3712 = vmatpush3.msra.mxu1 %v5159_v32  ;;  %3698 = vmatprep.subr.mxu0 %v5527_v14 }
 0x2e9   : > { %3713 = vmatprep.subr.mxu1 %v5527_v14  ;;  %3699 = vmatpush3.msra.mxu0 %v5251_v10 }
 0x2ea   : > { %3714 = vmatpush3.msra.mxu1 %v5172_v1  ;;  %3700 = vmatprep.subr.mxu0 %v5527_v14 }
 0x2eb   : > { %3715 = vmatprep.subr.mxu1 %v5527_v14  ;;  %3701 = vmatpush3.msra.mxu0 %v5265_v13 }
 0x2ec   : > { %3716 = vmatpush3.msra.mxu1 %v5185_v4  ;;  %3702 = vmatprep.subr.mxu0 %v5527_v14 }
 0x2ed   : > { %3717 = vmatprep.subr.mxu1 %v5527_v14  ;;  %3703 = vmatpush3.msra.mxu0 %v5277_v18 }
 0x2ee   : > { %3718 = vmatpush3.msra.mxu1 %v5195_v41  ;;  %3704 = vmatprep.subr.mxu0 %v5527_v14 }
 0x2ef   : > { %3719 = vmatprep.subr.mxu1 %v5527_v14  ;;  %3705 = vmatpush3.msra.mxu0 %v5284_v58 }
 0x2f0   : > { %3706 = vmatprep.mubr.msk.f32.mxu0 %vm3946_vm9, %v5527_v14  ;;  %3720 = vmatpush3.msra.mxu1 %v5204_v53 }
 0x2f1   : > { %3707 = vmatmul.mubr.f32.vlgmr.msra.gmra.mxu0 %v4915_v46  ;;  %3721 = vmatprep.subr.mxu1 %v5527_v14 }
 0x2f2   : > { %3732 = vmatprep.subr.mxu0 %v5527_v14  ;;  %3722 = vmatpush3.msra.mxu1 %v5220_v15 }
 0x2f3   : > { %3733 = vmatpush3.msra.mxu0 %v2826_v2  ;;  %3723 = vmatprep.subr.mxu1 %v5527_v14 }
 0x2f4   : > { %3734 = vmatprep.subr.mxu0 %v5527_v14  ;;  %3724 = vmatpush3.msra.mxu1 %v5239_v8 }
 0x2f5   : > { %3735 = vmatpush3.msra.mxu0 %v2833_v40  ;;  %3725 = vmatprep.subr.mxu1 %v5527_v14 }
 0x2f6   : > { %3736 = vmatprep.subr.mxu0 %v5527_v14  ;;  %3726 = vmatpush3.msra.mxu1 %v5254_v6 }
 0x2f7   : > { %3737 = vmatpush3.msra.mxu0 %v2840_v62  ;;  %3727 = vmatprep.subr.mxu1 %v5527_v14 }
 0x2f8   : > { %3738 = vmatprep.subr.mxu0 %v5527_v14  ;;  %3728 = vmatpush3.msra.mxu1 %v5267_v52 }
 0x2f9   : > { %3729 = vmatprep.mubr.msk.f32.mxu1 %vm3946_vm9, %v5527_v14  ;;  %3739 = vmatpush3.msra.mxu0 %v2847_v29 }
 0x2fa   : > { %3730 = vmatmul.mubr.f32.vlgmr.msra.gmra.mxu1 %v4962_v61  ;;  %3740 = vmatprep.subr.mxu0 %v5527_v14 }
 0x2fb   : > { %3755 = vmatprep.subr.mxu1 %v5527_v14  ;;  %3741 = vmatpush3.msra.mxu0 %v2854_v17 }
 0x2fc   : > { %3756 = vmatpush3.msra.mxu1 %v5144_v57  ;;  %3742 = vmatprep.subr.mxu0 %v5527_v14 }
 0x2fd   : > { %3757 = vmatprep.subr.mxu1 %v5527_v14  ;;  %3743 = vmatpush3.msra.mxu0 %v2861_v47 }
 0x2fe   : > { %3758 = vmatpush3.msra.mxu1 %v5159_v32  ;;  %3744 = vmatprep.subr.mxu0 %v5527_v14 }
 0x2ff   : > { %3759 = vmatprep.subr.mxu1 %v5527_v14  ;;  %3745 = vmatpush3.msra.mxu0 %v2868_v21 }
 0x300   : > { %3760 = vmatpush3.msra.mxu1 %v5172_v1  ;;  %3746 = vmatprep.subr.mxu0 %v5527_v14 }
 0x301   : > { %3761 = vmatprep.subr.mxu1 %v5527_v14  ;;  %3747 = vmatpush3.msra.mxu0 %v2875_v20 }
 0x302   : > { %3762 = vmatpush3.msra.mxu1 %v5185_v4  ;;  %3748 = vmatprep.subr.mxu0 %v5527_v14 }
 0x303   : > { %3763 = vmatprep.subr.mxu1 %v5527_v14  ;;  %3749 = vmatpush3.msra.mxu0 %v2882_v7 }
 0x304   : > { %3764 = vmatpush3.msra.mxu1 %v5195_v41  ;;  %3750 = vmatprep.subr.mxu0 %v5527_v14 }
 0x305   : > { %3765 = vmatprep.subr.mxu1 %v5527_v14  ;;  %3751 = vmatpush3.msra.mxu0 %v2889_v63 }
 0x306   : > { %3752 = vmatprep.mubr.msk.f32.mxu0 %vm3946_vm9, %v5527_v14  ;;  %3766 = vmatpush3.msra.mxu1 %v5204_v53 }
 0x307   : > { %3753 = vmatmul.mubr.f32.vlgmr.msra.gmra.mxu0 %v4869_v26  ;;  %3767 = vmatprep.subr.mxu1 %v5527_v14 }
 0x308   : > { %3768 = vmatpush3.msra.mxu1 %v5220_v15  ;;  %3775 = vmatprep.mubr.msk.f32.mxu1 %vm3946_vm9, %v5527_v14 }
 0x309   : > { %3769 = vmatprep.subr.mxu1 %v5527_v14 }
 0x30a   : > { %3770 = vmatpush3.msra.mxu1 %v5239_v8 }
 0x30b   : > { %3771 = vmatprep.subr.mxu1 %v5527_v14 }
 0x30c   : > { %3772 = vmatpush3.msra.mxu1 %v5254_v6 }
 0x30d   : > { %3773 = vmatprep.subr.mxu1 %v5527_v14 }
 0x30e   : > { %3774 = vmatpush3.msra.mxu1 %v5267_v52 }
 0x30f   : > { %3776 = vmatmul.mubr.f32.vlgmr.msra.gmra.mxu1 %v4869_v26 }
 0x35a   : > { %v2118_v46 = vpop.f32.mrf.mxu0 }
 0x35b   : > { %v2119_v12 = vadd.f32 %v2118_v46, %v2021_v55 }
 0x35c   : > { %v2120_v61 = vpop.f32.mrf.mxu0 }
 0x35d   : > { %v2121_v59 = vadd.f32 %v2120_v61, %v2021_v55 }
 0x362   : > { %v2290_v57 = vpop.f32.mrf.mxu1 }
 0x363   : > { %v2291_v41 = vadd.f32 %v2290_v57, %v2119_v12 }
 0x364   : > { %v2292_v1 = vpop.f32.mrf.mxu1 }
 0x365   : > { %v2293_v60 = vadd.f32 %v2292_v1, %v2121_v59 }
 0x36f   : > { %v2403_v32 = vpop.f32.mrf.mxu0 }
 0x370   : > { %v2404_v53 = vadd.f32 %v2403_v32, %v2291_v41 }
 0x371   : > { %v2405_v4 = vpop.f32.mrf.mxu0 }
 0x372   : > { %v2406_v40 = vadd.f32 %v2405_v4, %v2293_v60 }
 0x378   : > { %v2497_v2 = vpop.f32.mrf.mxu1 }
 0x379   : > { %v2498_v35 = vadd.f32 %v2497_v2, %v2404_v53 }
 0x37a   : > { %v2499_v14 = vpop.f32.mrf.mxu1 }
 0x37b   : > { %v2500_v26 = vadd.f32 %v2499_v14, %v2406_v40 }
 0x385   : > { %v2629_v42 = vpop.f32.mrf.mxu0 }
 0x386   : > { %v2630_v16 = vadd.f32 %v2629_v42, %v2498_v35 }
 0x387   : > { %v2631_v24 = vpop.f32.mrf.mxu0 }
 0x388   : > { %v2632_v11 = vadd.f32 %v2631_v24, %v2500_v26 }
 0x38e   : > { %v2721_v19 = vpop.f32.mrf.mxu1 }
 0x38f   : > { %v2722_v62 = vadd.f32 %v2721_v19, %v2630_v16 }
 0x390   : > { %v2723_v15 = vpop.f32.mrf.mxu1 }
 0x391   : > { %v3289_v54 = vmax.f32 %v2722_v62, 0.0  ;;  %v2724_v9 = vadd.f32 %v2723_v15, %v2632_v11 }
 0x393   : > { %3292 = vst [vmem:[%s267_s18] sm:$0xff] %v3289_v54  ;;  %v3290_v51 = vmax.f32 %v2724_v9, 0.0 }
 0x395   : > { %3293 = vst [vmem:[%s267_s18 + $0x8] sm:$0xff] %v3290_v51 }
 0x39b   : > { %v2807_v27 = vpop.f32.mrf.mxu0 }
 0x39c   : > { %v2808_v3 = vadd.f32 %v2807_v27, %v2021_v55 }
 0x39d   : > { %v3662_v28 = vpop.f32.mrf.mxu0 }
 0x3a4   : > { %v2928_v22 = vpop.f32.mrf.mxu1 }
 0x3a5   : > { %v2929_v17 = vadd.f32 %v2928_v22, %v2808_v3 }
 0x3a6   : > { %v3685_v29 = vpop.f32.mrf.mxu1 }
 0x3b1   : > { %v3020_v8 = vpop.f32.mrf.mxu0 }
 0x3b2   : > { %v3021_v47 = vadd.f32 %v3020_v8, %v2929_v17 }
 0x3b3   : > { %v3708_v43 = vpop.f32.mrf.mxu0 }
 0x3ba   : > { %v3103_v45 = vpop.f32.mrf.mxu1 }
 0x3bb   : > { %v3104_v31 = vadd.f32 %v3103_v45, %v3021_v47 }
 0x3bc   : > { %v3731_v44 = vpop.f32.mrf.mxu1 }
 0x3c7   : > { %v3204_v10 = vpop.f32.mrf.mxu0 }
 0x3c8   : > { %v3205_v13 = vadd.f32 %v3204_v10, %v3104_v31 }
 0x3c9   : > { %v3754_v6 = vpop.f32.mrf.mxu0 }
 0x3cf   : > { %v3285_v52 = vpop.f32.mrf.mxu1 }
 0x3d0   : > { %v3286_v0 = vadd.f32 %v3285_v52, %v3205_v13 }
 0x3d1   : > { %v3777_v21 = vpop.f32.mrf.mxu1 }
 0x3d2   : > { %v3291_v33 = vmax.f32 %v3286_v0, 0.0 }
 0x3d4   : > { %3294 = vst [vmem:[%s267_s18 + $0x10] sm:$0xff] %v3291_v33 }
 0x3d5   : > { %3882 = shalt.err (!%p3879_p10)
}
 0x3d6   : > { %s3883_s14 = scalar_lea.hbm %s3308_s17, 384  ;;  %s3887_s16 = scalar_lea.hbm %s5466_s6, 768 }
 0x3d7   : > { %p3884_p2 = scmp.ne.s32.totalorder %s3308_s17, %s3883_s14  ;;  %p3888_p7 = scmp.lt.s32.totalorder %s3308_s17, %s5466_s6 }
 0x3d8   : > { %p3889_p5 = scmp.lt.s32.totalorder %s3887_s16, %s3883_s14 }
 0x3d9   : > { %p3885_p4 = pnand %p3884_p2, %p5551_p12 }
 0x3da   : > { %p3890_p6 = por %p3889_p5, %p3888_p7 }
 0x3db   : > { %p3886_p9 = pneg %p3885_p4 }
 0x3dd   : > { %p3891_p11 = pnand %p3890_p6, %p3886_p9 }
 0x3df   : > { %3894 = shalt.err (!%p3891_p11)
}
 0x3e0   : > { %3785 = dma.vmem_to_hbm [thread:$0]  (%p5551_p12), %s3311_s11, 384, %s3308_s17, %s3296_s26  }
 0x3e1 PF: > { %s3322_s19 = sand.u32 1, %s3921_s21   ;;  %p5552_p13 = scmp.ne.s32.totalorder %s5505_s9, 0 }
 0x3e2   : > { %p5553_p0 = scmp.ge.s32.totalorder %s3933_s24, 2  ;;  %s3323_s13 = scalar_lea.sflag [#allocation7], %s3322_s19 }
 0x3e4   : > { %p3792_p1 = pnand %p5553_p0, %p5552_p13 }
 0x3e6   : > { %p3793_p3 = pneg %p3792_p1 }
 0x3e8   : > { %3916 = dma.done.wait (%p3793_p3), %s3323_s13, 384  }
 0x3e9   : > { %3918 = vsyncadd (%p3793_p3), %s3323_s13, 4294966912  ;;  %p19_p8 = scmp.ge.s32.totalorder %s4008_s27, 4   ;;  %s5554_s21 = smov %s3925_s22 }
 0x3ea   : > { %s5555_s22 = smov %s3929_s23  ;;  %s5556_s23 = smov %s4020_s30 }
 0x3eb   : > { %s5557_s24 = smov %s4008_s27  ;;  %21 = sbr.rel (!%p19_p8) target bundleno = 5 (0x5), region = 89 }
 0x3f0   :  { %3328 = vsyncpa [#allocation6], 1 }
 0x3f1   :  { %3330 = vsyncpa [#allocation6 + $0x1], 1 }
 0x3f2   :  { %3331 = vsyncpa [#allocation7], 1 }
 0x3f3   :  { %3333 = vsyncpa [#allocation7 + $0x1], 1 }

</bundles_post_ra>
